<compile_context>
chip_gen: v7x
topology: tpu7x:2x2x1
jax: 0.10.0
libtpu: 0.0.40
codegen_flags: <defaults>
</compile_context>

<pallas_src>
import functools

import jax
import jax.numpy as jnp
from jax import lax
from jax.experimental import pallas as pl
from jax.experimental.pallas import tpu as pltpu


# ---------------------------------------------------------------------------
# Pallas kernel: one grid step == one image, laid out as (H*W, C)
# ---------------------------------------------------------------------------
def _bottleneck_kernel(x_ref, w1_ref, b1_ref, w2_ref, b2_ref, w3_ref, b3_ref,
                       out_ref, pad_ref, *, H, W):
    HW, Cin = x_ref.shape           # HW = H*W
    P = w1_ref.shape[1]             # planes

    x = x_ref[...]                                        # (HW, Cin) f32 residual

    # ---- conv1 (1x1, BN scale folded) + bias + ReLU -----------------------
    h1 = jnp.dot(x.astype(jnp.bfloat16), w1_ref[...],
                 preferred_element_type=jnp.float32)
    h1 = jnp.maximum(h1 + b1_ref[...], 0.0)               # (HW, P) f32

    # ---- conv2 (3x3, pad=1, stride=1, BN folded) + bias + ReLU ------------
    # Spatially padded scratch: zero only the halo ring, then write h1 into
    # the interior.  Every tap below is an unmasked shifted slice.
    pad_ref[0:1, :, :] = jnp.zeros((1, W + 2, P), jnp.float32)
    pad_ref[H + 1:H + 2, :, :] = jnp.zeros((1, W + 2, P), jnp.float32)
    pad_ref[1:H + 1, 0:1, :] = jnp.zeros((H, 1, P), jnp.float32)
    pad_ref[1:H + 1, W + 1:W + 2, :] = jnp.zeros((H, 1, P), jnp.float32)
    pad_ref[1:H + 1, 1:W + 1, :] = h1.reshape(H, W, P)

    acc = jnp.zeros((HW, P), jnp.float32)
    for k in range(9):                                    # unrolled, static taps
        dy, dx = k // 3, k % 3
        patch = pad_ref[dy:dy + H, dx:dx + W, :].reshape(HW, P)
        acc = acc + jnp.dot(patch.astype(jnp.bfloat16), w2_ref[k],
                            preferred_element_type=jnp.float32)
    h2 = jnp.maximum(acc + b2_ref[...], 0.0)              # (HW, P) f32

    # ---- conv3 (1x1, BN folded) + bias + identity residual + ReLU ---------
    h3 = jnp.dot(h2.astype(jnp.bfloat16), w3_ref[...],
                 preferred_element_type=jnp.float32)
    out_ref[...] = jnp.maximum(h3 + b3_ref[...] + x, 0.0).astype(out_ref.dtype)


# ---------------------------------------------------------------------------
# Wrapper: NCHW tensors / PyTorch-layout weights -> kernel layout -> NCHW out
# ---------------------------------------------------------------------------
def bottleneck_forward(x_nchw, params, eps=1e-5):
    N, Cin, H, W = x_nchw.shape
    P = params["w1"].shape[0]
    C4 = params["w3"].shape[0]
    assert C4 == Cin, "downsample is None => inplanes must equal planes*4"
    HW = H * W

    # NCHW -> NHWC -> (N*H*W, C): channels on the 128-lane axis.
    x2d = jnp.transpose(x_nchw, (0, 2, 3, 1)).reshape(N * HW, Cin).astype(jnp.float32)

    def bn_fold(g, b, m, v):
        scale = g * lax.rsqrt(v + eps)
        bias = b - m * scale
        return scale.astype(jnp.float32), bias.astype(jnp.float32)

    s1, b1 = bn_fold(params["g1"], params["b1"], params["m1"], params["v1"])
    s2, b2 = bn_fold(params["g2"], params["b2"], params["m2"], params["v2"])
    s3, b3 = bn_fold(params["g3"], params["b3"], params["m3"], params["v3"])

    # Fold BN scales into the conv weights; matmul weights in bf16.
    w1m = (jnp.transpose(params["w1"][:, :, 0, 0], (1, 0))
           * s1[None, :]).astype(jnp.bfloat16)                       # (Cin, P)
    w2m = (jnp.transpose(params["w2"], (2, 3, 1, 0)).reshape(9, P, P)
           * s2[None, None, :]).astype(jnp.bfloat16)                 # (9, Pin, Pout)
    w3m = (jnp.transpose(params["w3"][:, :, 0, 0], (1, 0))
           * s3[None, :]).astype(jnp.bfloat16)                       # (P, C4)
    b1r = b1.reshape(1, P)
    b2r = b2.reshape(1, P)
    b3r = b3.reshape(1, C4)

    kernel = functools.partial(_bottleneck_kernel, H=H, W=W)

    def const_spec(shape):
        nd = len(shape)
        return pl.BlockSpec(shape, lambda n: (0,) * nd)   # resident, never re-fetched

    out2d = pl.pallas_call(
        kernel,
        out_shape=jax.ShapeDtypeStruct((N * HW, C4), jnp.float32),
        grid_spec=pltpu.PrefetchScalarGridSpec(
            num_scalar_prefetch=0,
            grid=(N,),
            in_specs=[
                pl.BlockSpec((HW, Cin), lambda n: (n, 0)),   # x: one image / step
                const_spec((Cin, P)), const_spec((1, P)),    # conv1 weight / bias
                const_spec((9, P, P)), const_spec((1, P)),   # conv2 weight / bias
                const_spec((P, C4)), const_spec((1, C4)),    # conv3 weight / bias
            ],
            out_specs=pl.BlockSpec((HW, C4), lambda n: (n, 0)),
            scratch_shapes=[pltpu.VMEM((H + 2, W + 2, P), jnp.float32)],
        ),
        compiler_params=pltpu.CompilerParams(
            dimension_semantics=("parallel",),     # v7x: images across 2 TCs
            vmem_limit_bytes=48 * 1024 * 1024,     # fits v7x 64MiB VMEM budget
        ),
    )(x2d, w1m, b1r, w2m, b2r, w3m, b3r)

    # (M, C) -> NHWC -> NCHW
    return jnp.transpose(out2d.reshape(N, H, W, C4), (0, 3, 1, 2))


# ---------------------------------------------------------------------------
# Pure-JAX reference (matches PyTorch eval-mode forward) for verification
# ---------------------------------------------------------------------------
def bottleneck_reference(x, p, eps=1e-5):
    def conv(x, w, pad=0):
        return lax.conv_general_dilated(
            x, w, (1, 1), [(pad, pad), (pad, pad)],
            dimension_numbers=("NCHW", "OIHW", "NCHW"))

    def bn(x, g, b, m, v):
        r = lambda t: t.reshape(1, -1, 1, 1)
        return (x - r(m)) / jnp.sqrt(r(v) + eps) * r(g) + r(b)

    out = jnp.maximum(bn(conv(x, p["w1"]), p["g1"], p["b1"], p["m1"], p["v1"]), 0.0)
    out = jnp.maximum(bn(conv(out, p["w2"], pad=1), p["g2"], p["b2"], p["m2"], p["v2"]), 0.0)
    out = bn(conv(out, p["w3"]), p["g3"], p["b3"], p["m3"], p["v3"])
    return jnp.maximum(out + x, 0.0)


# ---------------------------------------------------------------------------
def make_params(key, inplanes, planes):
    ks = jax.random.split(key, 12)
    P, C4 = planes, planes * 4

    def bn_params(k, c):
        k1, k2, k3, k4 = jax.random.split(k, 4)
        return (1.0 + 0.1 * jax.random.normal(k1, (c,), jnp.float32),   # gamma
                0.1 * jax.random.normal(k2, (c,), jnp.float32),         # beta
                0.1 * jax.random.normal(k3, (c,), jnp.float32),         # running_mean
                0.5 + jax.random.uniform(k4, (c,), jnp.float32))        # running_var

    g1, b1, m1, v1 = bn_params(ks[3], P)
    g2, b2, m2, v2 = bn_params(ks[4], P)
    g3, b3, m3, v3 = bn_params(ks[5], C4)
    return dict(
        w1=0.1 * jax.random.normal(ks[0], (P, inplanes, 1, 1), jnp.float32),
        w2=0.1 * jax.random.normal(ks[1], (P, P, 3, 3), jnp.float32),
        w3=0.1 * jax.random.normal(ks[2], (C4, P, 1, 1), jnp.float32),
        g1=g1, b1=b1, m1=m1, v1=v1,
        g2=g2, b2=b2, m2=m2, v2=v2,
        g3=g3, b3=b3, m3=m3, v3=v3,
    )


if __name__ == "__main__":
    key = jax.random.PRNGKey(0)
    kx, kp = jax.random.split(key)

    # Realistic (lane-dense) bottleneck widths: inplanes = planes*4 -> identity residual
    N, planes, H, W = 2, 64, 16, 16
    inplanes = planes * 4                      # 256
    x = jax.random.normal(kx, (N, inplanes, H, W), jnp.float32)
    params = make_params(kp, inplanes, planes)

    fwd = jax.jit(bottleneck_forward)
    out = jax.block_until_ready(fwd(x, params))

    ref = bottleneck_reference(x, params)
    assert out.shape == ref.shape == (N, inplanes, H, W)

    # bf16 matmuls with f32 accumulation -> check relative-to-scale error
    max_err = float(jnp.max(jnp.abs(out - ref)))
    scale = float(jnp.max(jnp.abs(ref)))
    assert max_err <= 2e-2 * scale + 1e-3, f"max abs err {max_err} (ref scale {scale})"

    print("KERNEL_OK")
</pallas_src>

<mosaic_0001>
module attributes {stable_mosaic.version = 11 : i64} {
  func.func @_bottleneck_kernel(%arg0: i32, %arg1: memref<256x256xf32, #tpu.memory_space<vmem>>, %arg2: memref<256x64xbf16, #tpu.memory_space<vmem>>, %arg3: memref<1x64xf32, #tpu.memory_space<vmem>>, %arg4: memref<9x64x64xbf16, #tpu.memory_space<vmem>>, %arg5: memref<1x64xf32, #tpu.memory_space<vmem>>, %arg6: memref<64x256xbf16, #tpu.memory_space<vmem>>, %arg7: memref<1x256xf32, #tpu.memory_space<vmem>>, %arg8: memref<256x256xf32, #tpu.memory_space<vmem>>, %arg9: memref<18x18x64xf32, #tpu.memory_space<vmem>>) attributes {dimension_semantics = [#tpu.dimension_semantics<parallel>], iteration_bounds = array<i64: 2>, scalar_prefetch = 0 : i64, scratch_operands = 1 : i64, tpu.core_type = #tpu.core_type<tc>, window_params = [{transform_indices = @transform_0, window_bounds = array<i64: 256, 256>}, {pipeline_mode = #tpu.pipeline_mode<synchronous>, transform_indices = @transform_1, window_bounds = array<i64: 256, 64>}, {pipeline_mode = #tpu.pipeline_mode<synchronous>, transform_indices = @transform_2, window_bounds = array<i64: 1, 64>}, {pipeline_mode = #tpu.pipeline_mode<synchronous>, transform_indices = @transform_3, window_bounds = array<i64: 9, 64, 64>}, {pipeline_mode = #tpu.pipeline_mode<synchronous>, transform_indices = @transform_4, window_bounds = array<i64: 1, 64>}, {pipeline_mode = #tpu.pipeline_mode<synchronous>, transform_indices = @transform_5, window_bounds = array<i64: 64, 256>}, {pipeline_mode = #tpu.pipeline_mode<synchronous>, transform_indices = @transform_6, window_bounds = array<i64: 1, 256>}, {transform_indices = @transform_7, window_bounds = array<i64: 256, 256>}]} {
    %c0 = arith.constant 0 : index
    %c0_0 = arith.constant 0 : index
    %0 = vector.load %arg1[%c0, %c0_0] : memref<256x256xf32, #tpu.memory_space<vmem>>, vector<256x256xf32>
    %1 = arith.truncf %0 : vector<256x256xf32> to vector<256x256xbf16>
    %c0_1 = arith.constant 0 : index
    %c0_2 = arith.constant 0 : index
    %2 = vector.load %arg2[%c0_1, %c0_2] : memref<256x64xbf16, #tpu.memory_space<vmem>>, vector<256x64xbf16>
    %cst = arith.constant dense<0.000000e+00> : vector<256x64xf32>
    %3 = tpu.matmul %1, %2, %cst {dimension_numbers = #tpu.dot_dimension_numbers<[1], [0], [0], [1], [0, 0, 1, 1], [], []>} : vector<256x256xbf16>, vector<256x64xbf16>, vector<256x64xf32> -> vector<256x64xf32>
    %c0_3 = arith.constant 0 : index
    %c0_4 = arith.constant 0 : index
    %4 = vector.load %arg3[%c0_3, %c0_4] : memref<1x64xf32, #tpu.memory_space<vmem>>, vector<1x64xf32>
    %5 = vector.broadcast %4 : vector<1x64xf32> to vector<256x64xf32>
    %6 = arith.addf %3, %5 : vector<256x64xf32>
    %cst_5 = arith.constant 0.000000e+00 : f32
    %7 = vector.broadcast %cst_5 : f32 to vector<256x64xf32>
    %8 = arith.maximumf %6, %7 : vector<256x64xf32>
    %cst_6 = arith.constant 0.000000e+00 : f32
    %9 = vector.broadcast %cst_6 : f32 to vector<1x18x64xf32>
    %c0_7 = arith.constant 0 : index
    %c0_8 = arith.constant 0 : index
    %c0_9 = arith.constant 0 : index
    %10 = vector.load %arg9[%c0_7, %c0_8, %c0_9] : memref<18x18x64xf32, #tpu.memory_space<vmem>>, vector<1x18x64xf32>
    tpu.vector_store %arg9[%c0_7, %c0_8, %c0_9], %9 {strides = array<i32>} : memref<18x18x64xf32, #tpu.memory_space<vmem>>, vector<1x18x64xf32>,
    %cst_10 = arith.constant 0.000000e+00 : f32
    %11 = vector.broadcast %cst_10 : f32 to vector<1x18x64xf32>
    %c17 = arith.constant 17 : index
    %c0_11 = arith.constant 0 : index
    %c0_12 = arith.constant 0 : index
    %12 = vector.load %arg9[%c17, %c0_11, %c0_12] : memref<18x18x64xf32, #tpu.memory_space<vmem>>, vector<1x18x64xf32>
    tpu.vector_store %arg9[%c17, %c0_11, %c0_12], %11 {strides = array<i32>} : memref<18x18x64xf32, #tpu.memory_space<vmem>>, vector<1x18x64xf32>,
    %cst_13 = arith.constant 0.000000e+00 : f32
    %13 = vector.broadcast %cst_13 : f32 to vector<16x1x64xf32>
    %c1 = arith.constant 1 : index
    %c0_14 = arith.constant 0 : index
    %c0_15 = arith.constant 0 : index
    %14 = vector.load %arg9[%c1, %c0_14, %c0_15] : memref<18x18x64xf32, #tpu.memory_space<vmem>>, vector<16x1x64xf32>
    tpu.vector_store %arg9[%c1, %c0_14, %c0_15], %13 {strides = array<i32>} : memref<18x18x64xf32, #tpu.memory_space<vmem>>, vector<16x1x64xf32>,
    %cst_16 = arith.constant 0.000000e+00 : f32
    %15 = vector.broadcast %cst_16 : f32 to vector<16x1x64xf32>
    %c1_17 = arith.constant 1 : index
    %c17_18 = arith.constant 17 : index
    %c0_19 = arith.constant 0 : index
    %16 = vector.load %arg9[%c1_17, %c17_18, %c0_19] : memref<18x18x64xf32, #tpu.memory_space<vmem>>, vector<16x1x64xf32>
    tpu.vector_store %arg9[%c1_17, %c17_18, %c0_19], %15 {strides = array<i32>} : memref<18x18x64xf32, #tpu.memory_space<vmem>>, vector<16x1x64xf32>,
    %17 = vector.shape_cast %8 : vector<256x64xf32> to vector<16x16x64xf32>
    %c1_20 = arith.constant 1 : index
    %c1_21 = arith.constant 1 : index
    %c0_22 = arith.constant 0 : index
    %18 = vector.load %arg9[%c1_20, %c1_21, %c0_22] : memref<18x18x64xf32, #tpu.memory_space<vmem>>, vector<16x16x64xf32>
    tpu.vector_store %arg9[%c1_20, %c1_21, %c0_22], %17 {strides = array<i32>} : memref<18x18x64xf32, #tpu.memory_space<vmem>>, vector<16x16x64xf32>,
    %cst_23 = arith.constant 0.000000e+00 : f32
    %19 = vector.broadcast %cst_23 : f32 to vector<256x64xf32>
    %c0_24 = arith.constant 0 : index
    %c0_25 = arith.constant 0 : index
    %c0_26 = arith.constant 0 : index
    %20 = vector.load %arg9[%c0_24, %c0_25, %c0_26] : memref<18x18x64xf32, #tpu.memory_space<vmem>>, vector<16x16x64xf32>
    %21 = vector.shape_cast %20 : vector<16x16x64xf32> to vector<256x64xf32>
    %22 = arith.truncf %21 : vector<256x64xf32> to vector<256x64xbf16>
    %c0_27 = arith.constant 0 : index
    %c0_28 = arith.constant 0 : index
    %c0_29 = arith.constant 0 : index
    %23 = vector.load %arg4[%c0_27, %c0_28, %c0_29] : memref<9x64x64xbf16, #tpu.memory_space<vmem>>, vector<1x64x64xbf16>
    %24 = vector.shape_cast %23 : vector<1x64x64xbf16> to vector<64x64xbf16>
    %cst_30 = arith.constant dense<0.000000e+00> : vector<256x64xf32>
    %25 = tpu.matmul %22, %24, %cst_30 {dimension_numbers = #tpu.dot_dimension_numbers<[1], [0], [0], [1], [0, 0, 1, 1], [], []>} : vector<256x64xbf16>, vector<64x64xbf16>, vector<256x64xf32> -> vector<256x64xf32>
    %26 = arith.addf %19, %25 : vector<256x64xf32>
    %c0_31 = arith.constant 0 : index
    %c1_32 = arith.constant 1 : index
    %c0_33 = arith.constant 0 : index
    %27 = vector.load %arg9[%c0_31, %c1_32, %c0_33] : memref<18x18x64xf32, #tpu.memory_space<vmem>>, vector<16x16x64xf32>
    %28 = vector.shape_cast %27 : vector<16x16x64xf32> to vector<256x64xf32>
    %29 = arith.truncf %28 : vector<256x64xf32> to vector<256x64xbf16>
    %c1_34 = arith.constant 1 : index
    %c0_35 = arith.constant 0 : index
    %c0_36 = arith.constant 0 : index
    %30 = vector.load %arg4[%c1_34, %c0_35, %c0_36] : memref<9x64x64xbf16, #tpu.memory_space<vmem>>, vector<1x64x64xbf16>
    %31 = vector.shape_cast %30 : vector<1x64x64xbf16> to vector<64x64xbf16>
    %cst_37 = arith.constant dense<0.000000e+00> : vector<256x64xf32>
    %32 = tpu.matmul %29, %31, %cst_37 {dimension_numbers = #tpu.dot_dimension_numbers<[1], [0], [0], [1], [0, 0, 1, 1], [], []>} : vector<256x64xbf16>, vector<64x64xbf16>, vector<256x64xf32> -> vector<256x64xf32>
    %33 = arith.addf %26, %32 : vector<256x64xf32>
    %c0_38 = arith.constant 0 : index
    %c2 = arith.constant 2 : index
    %c0_39 = arith.constant 0 : index
    %34 = vector.load %arg9[%c0_38, %c2, %c0_39] : memref<18x18x64xf32, #tpu.memory_space<vmem>>, vector<16x16x64xf32>
    %35 = vector.shape_cast %34 : vector<16x16x64xf32> to vector<256x64xf32>
    %36 = arith.truncf %35 : vector<256x64xf32> to vector<256x64xbf16>
    %c2_40 = arith.constant 2 : index
    %c0_41 = arith.constant 0 : index
    %c0_42 = arith.constant 0 : index
    %37 = vector.load %arg4[%c2_40, %c0_41, %c0_42] : memref<9x64x64xbf16, #tpu.memory_space<vmem>>, vector<1x64x64xbf16>
    %38 = vector.shape_cast %37 : vector<1x64x64xbf16> to vector<64x64xbf16>
    %cst_43 = arith.constant dense<0.000000e+00> : vector<256x64xf32>
    %39 = tpu.matmul %36, %38, %cst_43 {dimension_numbers = #tpu.dot_dimension_numbers<[1], [0], [0], [1], [0, 0, 1, 1], [], []>} : vector<256x64xbf16>, vector<64x64xbf16>, vector<256x64xf32> -> vector<256x64xf32>
    %40 = arith.addf %33, %39 : vector<256x64xf32>
    %c1_44 = arith.constant 1 : index
    %c0_45 = arith.constant 0 : index
    %c0_46 = arith.constant 0 : index
    %41 = vector.load %arg9[%c1_44, %c0_45, %c0_46] : memref<18x18x64xf32, #tpu.memory_space<vmem>>, vector<16x16x64xf32>
    %42 = vector.shape_cast %41 : vector<16x16x64xf32> to vector<256x64xf32>
    %43 = arith.truncf %42 : vector<256x64xf32> to vector<256x64xbf16>
    %c3 = arith.constant 3 : index
    %c0_47 = arith.constant 0 : index
    %c0_48 = arith.constant 0 : index
    %44 = vector.load %arg4[%c3, %c0_47, %c0_48] : memref<9x64x64xbf16, #tpu.memory_space<vmem>>, vector<1x64x64xbf16>
    %45 = vector.shape_cast %44 : vector<1x64x64xbf16> to vector<64x64xbf16>
    %cst_49 = arith.constant dense<0.000000e+00> : vector<256x64xf32>
    %46 = tpu.matmul %43, %45, %cst_49 {dimension_numbers = #tpu.dot_dimension_numbers<[1], [0], [0], [1], [0, 0, 1, 1], [], []>} : vector<256x64xbf16>, vector<64x64xbf16>, vector<256x64xf32> -> vector<256x64xf32>
    %47 = arith.addf %40, %46 : vector<256x64xf32>
    %c1_50 = arith.constant 1 : index
    %c1_51 = arith.constant 1 : index
    %c0_52 = arith.constant 0 : index
    %48 = vector.load %arg9[%c1_50, %c1_51, %c0_52] : memref<18x18x64xf32, #tpu.memory_space<vmem>>, vector<16x16x64xf32>
    %49 = vector.shape_cast %48 : vector<16x16x64xf32> to vector<256x64xf32>
    %50 = arith.truncf %49 : vector<256x64xf32> to vector<256x64xbf16>
    %c4 = arith.constant 4 : index
    %c0_53 = arith.constant 0 : index
    %c0_54 = arith.constant 0 : index
    %51 = vector.load %arg4[%c4, %c0_53, %c0_54] : memref<9x64x64xbf16, #tpu.memory_space<vmem>>, vector<1x64x64xbf16>
    %52 = vector.shape_cast %51 : vector<1x64x64xbf16> to vector<64x64xbf16>
    %cst_55 = arith.constant dense<0.000000e+00> : vector<256x64xf32>
    %53 = tpu.matmul %50, %52, %cst_55 {dimension_numbers = #tpu.dot_dimension_numbers<[1], [0], [0], [1], [0, 0, 1, 1], [], []>} : vector<256x64xbf16>, vector<64x64xbf16>, vector<256x64xf32> -> vector<256x64xf32>
    %54 = arith.addf %47, %53 : vector<256x64xf32>
    %c1_56 = arith.constant 1 : index
    %c2_57 = arith.constant 2 : index
    %c0_58 = arith.constant 0 : index
    %55 = vector.load %arg9[%c1_56, %c2_57, %c0_58] : memref<18x18x64xf32, #tpu.memory_space<vmem>>, vector<16x16x64xf32>
    %56 = vector.shape_cast %55 : vector<16x16x64xf32> to vector<256x64xf32>
    %57 = arith.truncf %56 : vector<256x64xf32> to vector<256x64xbf16>
    %c5 = arith.constant 5 : index
    %c0_59 = arith.constant 0 : index
    %c0_60 = arith.constant 0 : index
    %58 = vector.load %arg4[%c5, %c0_59, %c0_60] : memref<9x64x64xbf16, #tpu.memory_space<vmem>>, vector<1x64x64xbf16>
    %59 = vector.shape_cast %58 : vector<1x64x64xbf16> to vector<64x64xbf16>
    %cst_61 = arith.constant dense<0.000000e+00> : vector<256x64xf32>
    %60 = tpu.matmul %57, %59, %cst_61 {dimension_numbers = #tpu.dot_dimension_numbers<[1], [0], [0], [1], [0, 0, 1, 1], [], []>} : vector<256x64xbf16>, vector<64x64xbf16>, vector<256x64xf32> -> vector<256x64xf32>
    %61 = arith.addf %54, %60 : vector<256x64xf32>
    %c2_62 = arith.constant 2 : index
    %c0_63 = arith.constant 0 : index
    %c0_64 = arith.constant 0 : index
    %62 = vector.load %arg9[%c2_62, %c0_63, %c0_64] : memref<18x18x64xf32, #tpu.memory_space<vmem>>, vector<16x16x64xf32>
    %63 = vector.shape_cast %62 : vector<16x16x64xf32> to vector<256x64xf32>
    %64 = arith.truncf %63 : vector<256x64xf32> to vector<256x64xbf16>
    %c6 = arith.constant 6 : index
    %c0_65 = arith.constant 0 : index
    %c0_66 = arith.constant 0 : index
    %65 = vector.load %arg4[%c6, %c0_65, %c0_66] : memref<9x64x64xbf16, #tpu.memory_space<vmem>>, vector<1x64x64xbf16>
    %66 = vector.shape_cast %65 : vector<1x64x64xbf16> to vector<64x64xbf16>
    %cst_67 = arith.constant dense<0.000000e+00> : vector<256x64xf32>
    %67 = tpu.matmul %64, %66, %cst_67 {dimension_numbers = #tpu.dot_dimension_numbers<[1], [0], [0], [1], [0, 0, 1, 1], [], []>} : vector<256x64xbf16>, vector<64x64xbf16>, vector<256x64xf32> -> vector<256x64xf32>
    %68 = arith.addf %61, %67 : vector<256x64xf32>
    %c2_68 = arith.constant 2 : index
    %c1_69 = arith.constant 1 : index
    %c0_70 = arith.constant 0 : index
    %69 = vector.load %arg9[%c2_68, %c1_69, %c0_70] : memref<18x18x64xf32, #tpu.memory_space<vmem>>, vector<16x16x64xf32>
    %70 = vector.shape_cast %69 : vector<16x16x64xf32> to vector<256x64xf32>
    %71 = arith.truncf %70 : vector<256x64xf32> to vector<256x64xbf16>
    %c7 = arith.constant 7 : index
    %c0_71 = arith.constant 0 : index
    %c0_72 = arith.constant 0 : index
    %72 = vector.load %arg4[%c7, %c0_71, %c0_72] : memref<9x64x64xbf16, #tpu.memory_space<vmem>>, vector<1x64x64xbf16>
    %73 = vector.shape_cast %72 : vector<1x64x64xbf16> to vector<64x64xbf16>
    %cst_73 = arith.constant dense<0.000000e+00> : vector<256x64xf32>
    %74 = tpu.matmul %71, %73, %cst_73 {dimension_numbers = #tpu.dot_dimension_numbers<[1], [0], [0], [1], [0, 0, 1, 1], [], []>} : vector<256x64xbf16>, vector<64x64xbf16>, vector<256x64xf32> -> vector<256x64xf32>
    %75 = arith.addf %68, %74 : vector<256x64xf32>
    %c2_74 = arith.constant 2 : index
    %c2_75 = arith.constant 2 : index
    %c0_76 = arith.constant 0 : index
    %76 = vector.load %arg9[%c2_74, %c2_75, %c0_76] : memref<18x18x64xf32, #tpu.memory_space<vmem>>, vector<16x16x64xf32>
    %77 = vector.shape_cast %76 : vector<16x16x64xf32> to vector<256x64xf32>
    %78 = arith.truncf %77 : vector<256x64xf32> to vector<256x64xbf16>
    %c8 = arith.constant 8 : index
    %c0_77 = arith.constant 0 : index
    %c0_78 = arith.constant 0 : index
    %79 = vector.load %arg4[%c8, %c0_77, %c0_78] : memref<9x64x64xbf16, #tpu.memory_space<vmem>>, vector<1x64x64xbf16>
    %80 = vector.shape_cast %79 : vector<1x64x64xbf16> to vector<64x64xbf16>
    %cst_79 = arith.constant dense<0.000000e+00> : vector<256x64xf32>
    %81 = tpu.matmul %78, %80, %cst_79 {dimension_numbers = #tpu.dot_dimension_numbers<[1], [0], [0], [1], [0, 0, 1, 1], [], []>} : vector<256x64xbf16>, vector<64x64xbf16>, vector<256x64xf32> -> vector<256x64xf32>
    %82 = arith.addf %75, %81 : vector<256x64xf32>
    %c0_80 = arith.constant 0 : index
    %c0_81 = arith.constant 0 : index
    %83 = vector.load %arg5[%c0_80, %c0_81] : memref<1x64xf32, #tpu.memory_space<vmem>>, vector<1x64xf32>
    %84 = vector.broadcast %83 : vector<1x64xf32> to vector<256x64xf32>
    %85 = arith.addf %82, %84 : vector<256x64xf32>
    %cst_82 = arith.constant 0.000000e+00 : f32
    %86 = vector.broadcast %cst_82 : f32 to vector<256x64xf32>
    %87 = arith.maximumf %85, %86 : vector<256x64xf32>
    %88 = arith.truncf %87 : vector<256x64xf32> to vector<256x64xbf16>
    %c0_83 = arith.constant 0 : index
    %c0_84 = arith.constant 0 : index
    %89 = vector.load %arg6[%c0_83, %c0_84] : memref<64x256xbf16, #tpu.memory_space<vmem>>, vector<64x256xbf16>
    %cst_85 = arith.constant dense<0.000000e+00> : vector<256x256xf32>
    %90 = tpu.matmul %88, %89, %cst_85 {dimension_numbers = #tpu.dot_dimension_numbers<[1], [0], [0], [1], [0, 0, 1, 1], [], []>} : vector<256x64xbf16>, vector<64x256xbf16>, vector<256x256xf32> -> vector<256x256xf32>
    %c0_86 = arith.constant 0 : index
    %c0_87 = arith.constant 0 : index
    %91 = vector.load %arg7[%c0_86, %c0_87] : memref<1x256xf32, #tpu.memory_space<vmem>>, vector<1x256xf32>
    %92 = vector.broadcast %91 : vector<1x256xf32> to vector<256x256xf32>
    %93 = arith.addf %90, %92 : vector<256x256xf32>
    %94 = arith.addf %93, %0 : vector<256x256xf32>
    %cst_88 = arith.constant 0.000000e+00 : f32
    %95 = vector.broadcast %cst_88 : f32 to vector<256x256xf32>
    %96 = arith.maximumf %94, %95 : vector<256x256xf32>
    %c0_89 = arith.constant 0 : index
    %c0_90 = arith.constant 0 : index
    %97 = vector.load %arg8[%c0_89, %c0_90] : memref<256x256xf32, #tpu.memory_space<vmem>>, vector<256x256xf32>
    tpu.vector_store %arg8[%c0_89, %c0_90], %96 {strides = array<i32>} : memref<256x256xf32, #tpu.memory_space<vmem>>, vector<256x256xf32>,
    return
  }
  func.func @transform_0(%arg0: i32) -> (i32, i32) {
    %c0_i32 = arith.constant 0 : i32
    %c0_i32_0 = arith.constant 0 : i32
    return %arg0, %c0_i32 : i32, i32
  }
  func.func @transform_1(%arg0: i32) -> (i32, i32) {
    %c0_i32 = arith.constant 0 : i32
    %c0_i32_0 = arith.constant 0 : i32
    %c0_i32_1 = arith.constant 0 : i32
    return %c0_i32, %c0_i32_0 : i32, i32
  }
  func.func @transform_2(%arg0: i32) -> (i32, i32) {
    %c0_i32 = arith.constant 0 : i32
    %c0_i32_0 = arith.constant 0 : i32
    %c0_i32_1 = arith.constant 0 : i32
    return %c0_i32, %c0_i32_0 : i32, i32
  }
  func.func @transform_3(%arg0: i32) -> (i32, i32, i32) {
    %c0_i32 = arith.constant 0 : i32
    %c0_i32_0 = arith.constant 0 : i32
    %c0_i32_1 = arith.constant 0 : i32
    %c0_i32_2 = arith.constant 0 : i32
    return %c0_i32, %c0_i32_0, %c0_i32_1 : i32, i32, i32
  }
  func.func @transform_4(%arg0: i32) -> (i32, i32) {
    %c0_i32 = arith.constant 0 : i32
    %c0_i32_0 = arith.constant 0 : i32
    %c0_i32_1 = arith.constant 0 : i32
    return %c0_i32, %c0_i32_0 : i32, i32
  }
  func.func @transform_5(%arg0: i32) -> (i32, i32) {
    %c0_i32 = arith.constant 0 : i32
    %c0_i32_0 = arith.constant 0 : i32
    %c0_i32_1 = arith.constant 0 : i32
    return %c0_i32, %c0_i32_0 : i32, i32
  }
  func.func @transform_6(%arg0: i32) -> (i32, i32) {
    %c0_i32 = arith.constant 0 : i32
    %c0_i32_0 = arith.constant 0 : i32
    %c0_i32_1 = arith.constant 0 : i32
    return %c0_i32, %c0_i32_0 : i32, i32
  }
  func.func @transform_7(%arg0: i32) -> (i32, i32) {
    %c0_i32 = arith.constant 0 : i32
    %c0_i32_0 = arith.constant 0 : i32
    return %arg0, %c0_i32 : i32, i32
  }
}

</mosaic_0001>

<bundles_post_ra>
// kernel: bottleneck_forward.1
= control target key start
LH: loop header
LB: loop body
LE: loop exit
PB: predicated region body
PF: predicated region fallthrough
CT: control target
= control target key end

     0   :  { %12 = vsyncpa [#allocation4], 0  ;;  %s6993_s0 = inlined_call_operand.vmem [shape: f32[512,256], index: 0, kind: input, shape index: {}]   ;;  %s6994_s1 = inlined_call_operand.vmem [shape: bf16[256,64], index: 1, kind: input, shape index: {}]   ;;  %s6995_s2 = inlined_call_operand.vmem [shape: f32[1,64], index: 2, kind: input, shape index: {}]   ;;  %s6996_s3 = inlined_call_operand.vmem [shape: bf16[9,64,64], index: 3, kind: input, shape index: {}]   ;;  %s6997_s4 = inlined_call_operand.vmem [shape: f32[1,64], index: 4, kind: input, shape index: {}]   ;;  %s6998_s5 = inlined_call_operand.vmem [shape: bf16[64,256], index: 5, kind: input, shape index: {}]   ;;  %s6999_s6 = inlined_call_operand.vmem [shape: f32[1,256], index: 6, kind: input, shape index: {}]   ;;  %s7000_s7 = inlined_call_operand.hbm [shape: f32[512,256], index: 7, kind: output, shape index: {}]  }
   0x1   :  { %14 = vsyncpa [#allocation4 + $0x1], 0  ;;  %s5773_s24 = smov 0   ;;  %s5775_s25 = smov 0  }
   0x2   :  { %s5777_s26 = smov 0   ;;  %s5779_s27 = smov 0  }
   0x3 LB: > { %s5794_s28 = sadd.s32 4294967295, %s5726_s27   ;;  %s4274_s29 = sadd.s32 4294967294, %s5726_s27   ;;  %s5726_s27 = sphi %s5779_s27, %s7006_s27   ;;  %s5722_s26 = sphi %s5777_s26, %s7005_s26   ;;  %s5718_s25 = sphi %s5775_s25, %s7004_s25   ;;  %s5714_s24 = sphi %s5773_s24, %s7003_s24  }
   0x4   : > { %s5798_s30 = sadd.s32 1, %s5726_s27   ;;  %s179_s8 = sadd.s32 1, %s5722_s26 }
   0x5   : > { %s176_s9 = ssub.s32 %s5726_s27, %s5798_s30  ;;  %p189_p0 = scmp.ne.s32.totalorder %s5722_s26, %s5718_s25 }
   0x6   : > { %p177_p1 = scmp.eq.s32.totalorder %s176_s9, 0  ;;  %p190_p2 = scmp.eq.s32.totalorder %s5794_s28, 1 }
   0x7   : > { %p195_p3 = scmp.ne.s32.totalorder %s5718_s25, %s5714_s24  ;;  %p196_p4 = scmp.eq.s32.totalorder %s4274_s29, 1 }
   0x8   : > { %s5809_s10 = scalar_select %p177_p1, %s5722_s26, %s179_s8  }
   0x9   : > { %p5811_p5 = por %p190_p2, %p189_p0  ;;  %p5815_p6 = por %p196_p4, %p195_p3 }
   0xa   : > { %p4277_p7 = scmp.ge.s32.totalorder %s5726_s27, 1  ;;  %p242_p8 = scmp.lt.s32.totalorder %s5726_s27, 3 }
   0xc   : > { %p243_p9 = pnand %p4277_p7, %p242_p8 }
   0xd   : > { %v5536_v0 = vld [vmem:[%s6994_s1 + $0x40] sm:$0xff] (!%p243_p9)   ;;  %s4279_s15 = sshll.u32 (!%p243_p9), %s5794_s28, 5  ;;  %v5538_v2 = vld [vmem:[%s6994_s1 + $0x48] sm:$0xff] (!%p243_p9)   ;;  %v5540_v4 = vld [vmem:[%s6994_s1 + $0x50] sm:$0xff] (!%p243_p9)   ;;  %vm708_vm0 = vcmask (!%p243_p9), 523264   ;;  %vm718_vm1 = vcmask (!%p243_p9), 516096  }
   0xe   : > { %246 = sbr.rel (%p243_p9) target bundleno = 1297 (0x511), region = 48  ;;  %v5537_v1 = vld [vmem:[%s6994_s1] sm:$0xff] (!%p243_p9)   ;;  %4577 = vmatprep.subr.bf16.mxu0 (!%p243_p9), %v5536_v0  ;;  %p276_p10 = scmp.lt.s32.totalorder (!%p243_p9), %s4279_s15, 63  ;;  %v5539_v3 = vld [vmem:[%s6994_s1 + $0x8] sm:$0xff] (!%p243_p9)   ;;  %v5541_v5 = vld [vmem:[%s6994_s1 + $0x10] sm:$0xff] (!%p243_p9)   ;;  %vm711_vm2 = vcmask (!%p243_p9), 517120  }
   0xf   : > { %4578 = vmatpush3.bf16.msra.mxu0 (!%p243_p9), %v5537_v1  ;;  %v5542_v6 = vld [vmem:[%s6994_s1 + $0x58] sm:$0xff] (!%p243_p9)   ;;  %v5544_v8 = vld [vmem:[%s6994_s1 + $0x60] sm:$0xff] (!%p243_p9)   ;;  %v5546_v10 = vld [vmem:[%s6994_s1 + $0x68] sm:$0xff] (!%p243_p9)   ;;  %s272_s9 = sand.u32 (!%p243_p9), 1, %s5718_s25   ;;  %s4576_s16 = sshll.u32 (!%p243_p9), %s5794_s28, 13 }
  0x10   : > { %4579 = vmatprep.subr.bf16.mxu0 (!%p243_p9), %v5538_v2  ;;  %v5543_v7 = vld [vmem:[%s6994_s1 + $0x18] sm:$0xff] (!%p243_p9)   ;;  %v5545_v9 = vld [vmem:[%s6994_s1 + $0x20] sm:$0xff] (!%p243_p9)   ;;  %v5547_v14 = vld [vmem:[%s6994_s1 + $0x28] sm:$0xff] (!%p243_p9)   ;;  %s4278_s13 = sshll.u32 (!%p243_p9), %s272_s9, 9  ;;  %s6943_s20 = scalar_lea.hbm (!%p243_p9), %s7000_s7, %s4576_s16 }
  0x11   : > { %v5548_v15 = vld [vmem:[%s6994_s1 + $0x70] sm:$0xff] (!%p243_p9)   ;;  %v5550_v17 = vld [vmem:[%s6994_s1 + $0x78] sm:$0xff] (!%p243_p9)   ;;  %s6952_s28 = scalar_lea.sflag (!%p243_p9), [#allocation4], %s272_s9  ;;  %s5730_s21 = smov (!%p243_p9), [#allocation3]  }
  0x12   : > { %v5549_v16 = vld [vmem:[%s6994_s1 + $0x30] sm:$0xff] (!%p243_p9)   ;;  %v5551_v18 = vld [vmem:[%s6994_s1 + $0x38] sm:$0xff] (!%p243_p9)   ;;  %s5668_s23 = sshll.u32 (!%p243_p9), %s5730_s21, 4  ;;  %s5669_s23 = int_to_ptr.vmem [resolvable:$false] %s5668_s23 }
  0x13   : > { %4580 = vmatpush3.bf16.msra.mxu0 (!%p243_p9), %v5539_v3 }
  0x14   : > { %4581 = vmatprep.subr.bf16.mxu0 (!%p243_p9), %v5540_v4 }
  0x15   : > { %s7008_s15 = smov (!%p276_p10, %s4279_s15), 63 }
  0x16   : > { %s4574_s14 = sshll.u32 %s7008_s15, 4  ;;  %s5670_s15 = scalar_lea.vmem %s5669_s23, 16384 }
  0x17   : > { %4582 = vmatpush3.bf16.msra.mxu0 %v5541_v5  ;;  %s5852_s22 = scalar_lea.vmem %s6993_s0, %s4574_s14  ;;  %s6755_s14 = scalar_lea.vmem [#allocation3], %s4278_s13 }
  0x18   : > { %4583 = vmatprep.subr.bf16.mxu0 %v5542_v6  ;;  %v285_v11 = vld [vmem:[%s5852_s22 + $0x8] sm:$0xff]  ;;  %v287_v12 = vld [vmem:[%s5852_s22 + $0x18] sm:$0xff]  ;;  %v284_v19 = vld [vmem:[%s5852_s22] sm:$0xff]  ;;  %s4212_s17 = sshll.u32 %s6755_s14, 4  ;;  %s6945_s17 = int_to_ptr.vmem [resolvable:$true] %s4212_s17 }
  0x19   : > { %v349_v13 = vpack.c.bf16 %v287_v12, %v285_v11  ;;  %v286_v20 = vld [vmem:[%s5852_s22 + $0x10] sm:$0xff]  ;;  %v289_v21 = vld [vmem:[%s5852_s22 + $0x28] sm:$0xff]  ;;  %v291_v22 = vld [vmem:[%s5852_s22 + $0x38] sm:$0xff]  ;;  %p5671_p0 = scmp.lt.s32.totalorder %s6945_s17, %s5669_s23 }
  0x1a   : > { %v348_v23 = vpack.c.bf16 %v286_v20, %v284_v19  ;;  %v351_v24 = vpack.c.bf16 %v291_v22, %v289_v21  ;;  %v288_v25 = vld [vmem:[%s5852_s22 + $0x20] sm:$0xff]  ;;  %v290_v26 = vld [vmem:[%s5852_s22 + $0x30] sm:$0xff]  ;;  %v293_v27 = vld [vmem:[%s5852_s22 + $0x48] sm:$0xff] }
  0x1b   : > { %4584 = vmatpush3.bf16.msra.mxu0 %v5543_v7  ;;  %547 = vmatprep.mubr.bf16.mxu0 %v349_v13  ;;  %v295_v28 = vld [vmem:[%s5852_s22 + $0x58] sm:$0xff]  ;;  %v350_v29 = vpack.c.bf16 %v290_v26, %v288_v25  ;;  %v292_v31 = vld [vmem:[%s5852_s22 + $0x40] sm:$0xff]  ;;  %v294_v32 = vld [vmem:[%s5852_s22 + $0x50] sm:$0xff] }
  0x1c   : > { %4585 = vmatprep.subr.bf16.mxu0 %v5544_v8  ;;  %v353_v30 = vpack.c.bf16 %v295_v28, %v293_v27  ;;  %v297_v33 = vld [vmem:[%s5852_s22 + $0x68] sm:$0xff]  ;;  %v299_v34 = vld [vmem:[%s5852_s22 + $0x78] sm:$0xff]  ;;  %v352_v35 = vpack.c.bf16 %v294_v32, %v292_v31  ;;  %v296_v37 = vld [vmem:[%s5852_s22 + $0x60] sm:$0xff] }
  0x1d   : > { %v355_v36 = vpack.c.bf16 %v299_v34, %v297_v33  ;;  %v298_v38 = vld [vmem:[%s5852_s22 + $0x70] sm:$0xff]  ;;  %v301_v39 = vld [vmem:[%s5852_s22 + $0x88] sm:$0xff]  ;;  %v303_v40 = vld [vmem:[%s5852_s22 + $0x98] sm:$0xff]  ;;  %v5728_v33 = vmov 0.0  }
  0x1e   : > { %v354_v41 = vpack.c.bf16 %v298_v38, %v296_v37  ;;  %v357_v42 = vpack.c.bf16 %v303_v40, %v301_v39  ;;  %v300_v43 = vld [vmem:[%s5852_s22 + $0x80] sm:$0xff]  ;;  %v302_v44 = vld [vmem:[%s5852_s22 + $0x90] sm:$0xff]  ;;  %v305_v45 = vld [vmem:[%s5852_s22 + $0xa8] sm:$0xff]  ;;  %709 = vst.msk [vmem:[#allocation2] sm:$0xff] %vm708_vm0, %v5728_v33 }
  0x1f   : > { %4586 = vmatpush3.bf16.msra.mxu0 %v5545_v9  ;;  %v307_v46 = vld [vmem:[%s5852_s22 + $0xb8] sm:$0xff]  ;;  %v356_v47 = vpack.c.bf16 %v302_v44, %v300_v43  ;;  %v304_v49 = vld [vmem:[%s5852_s22 + $0xa0] sm:$0xff]  ;;  %v306_v50 = vld [vmem:[%s5852_s22 + $0xb0] sm:$0xff]  ;;  %710 = vst.msk [vmem:[#allocation2 + $0x8] sm:$0xff] %vm708_vm0, %v5728_v33 }
  0x20   : > { %4587 = vmatprep.subr.bf16.mxu0 %v5546_v10  ;;  %v359_v48 = vpack.c.bf16 %v307_v46, %v305_v45  ;;  %v309_v51 = vld [vmem:[%s5852_s22 + $0xc8] sm:$0xff]  ;;  %v311_v52 = vld [vmem:[%s5852_s22 + $0xd8] sm:$0xff]  ;;  %v358_v53 = vpack.c.bf16 %v306_v50, %v304_v49  ;;  %v308_v55 = vld [vmem:[%s5852_s22 + $0xc0] sm:$0xff]  ;;  %714 = vst.msk [vmem:[#allocation2 + $0x198] sm:$0xff] %vm708_vm0, %v5728_v33 }
  0x21   : > { %v361_v54 = vpack.c.bf16 %v311_v52, %v309_v51  ;;  %v310_v56 = vld [vmem:[%s5852_s22 + $0xd0] sm:$0xff]  ;;  %v313_v57 = vld [vmem:[%s5852_s22 + $0xe8] sm:$0xff]  ;;  %v315_v58 = vld [vmem:[%s5852_s22 + $0xf8] sm:$0xff]  ;;  %715 = vst.msk [vmem:[#allocation2 + $0x1a0] sm:$0xff] %vm708_vm0, %v5728_v33 }
  0x22   : > { %v360_v59 = vpack.c.bf16 %v310_v56, %v308_v55  ;;  %v363_v60 = vpack.c.bf16 %v315_v58, %v313_v57  ;;  %v312_v61 = vld [vmem:[%s5852_s22 + $0xe0] sm:$0xff]  ;;  %v314_v62 = vld [vmem:[%s5852_s22 + $0xf0] sm:$0xff]  ;;  %v317_v63 = vld [vmem:[%s5852_s22 + $0x108] sm:$0xff]  ;;  %740 = vst.msk [vmem:[#allocation2 + $0xa1] sm:$0x1] %vm718_vm1, %v5728_v33 }
  0x23   : > { %4588 = vmatpush3.bf16.msra.mxu0 %v5547_v14  ;;  %v319_v0 = vld [vmem:[%s5852_s22 + $0x118] sm:$0xff]  ;;  %v362_v1 = vpack.c.bf16 %v314_v62, %v312_v61  ;;  %v316_v3 = vld [vmem:[%s5852_s22 + $0x100] sm:$0xff]  ;;  %v318_v4 = vld [vmem:[%s5852_s22 + $0x110] sm:$0xff]  ;;  %719 = vst.msk [vmem:[#allocation2 + $0x18] sm:$0x1] %vm718_vm1, %v5728_v33 }
  0x24   : > { %4589 = vmatprep.subr.bf16.mxu0 %v5548_v15  ;;  %v365_v2 = vpack.c.bf16 %v319_v0, %v317_v63  ;;  %v321_v5 = vld [vmem:[%s5852_s22 + $0x128] sm:$0xff]  ;;  %v323_v6 = vld [vmem:[%s5852_s22 + $0x138] sm:$0xff]  ;;  %v364_v7 = vpack.c.bf16 %v318_v4, %v316_v3  ;;  %v320_v9 = vld [vmem:[%s5852_s22 + $0x120] sm:$0xff]  ;;  %720 = vst.msk [vmem:[#allocation2 + $0x30] sm:$0x1] %vm718_vm1, %v5728_v33 }
  0x25   : > { %v367_v8 = vpack.c.bf16 %v323_v6, %v321_v5  ;;  %v322_v10 = vld [vmem:[%s5852_s22 + $0x130] sm:$0xff]  ;;  %v325_v11 = vld [vmem:[%s5852_s22 + $0x148] sm:$0xff]  ;;  %v327_v12 = vld [vmem:[%s5852_s22 + $0x158] sm:$0xff]  ;;  %721 = vst.msk [vmem:[#allocation2 + $0x48] sm:$0x1] %vm718_vm1, %v5728_v33 }
  0x26   : > { %v366_v13 = vpack.c.bf16 %v322_v10, %v320_v9  ;;  %v369_v14 = vpack.c.bf16 %v327_v12, %v325_v11  ;;  %v324_v15 = vld [vmem:[%s5852_s22 + $0x140] sm:$0xff]  ;;  %v330_v22 = vld [vmem:[%s5852_s22 + $0x170] sm:$0xff]  ;;  %v337_v31 = vld [vmem:[%s5852_s22 + $0x1a8] sm:$0xff]  ;;  %722 = vst.msk [vmem:[#allocation2 + $0x60] sm:$0x1] %vm718_vm1, %v5728_v33 }
  0x27   : > { %4590 = vmatpush3.bf16.msra.mxu0 %v5549_v16  ;;  %v326_v16 = vld [vmem:[%s5852_s22 + $0x150] sm:$0xff]  ;;  %v328_v21 = vld [vmem:[%s5852_s22 + $0x160] sm:$0xff]  ;;  %v339_v32 = vld [vmem:[%s5852_s22 + $0x1b8] sm:$0xff]  ;;  %723 = vst.msk [vmem:[#allocation2 + $0x78] sm:$0x1] %vm718_vm1, %v5728_v33 }
  0x28   : > { %4591 = vmatprep.subr.bf16.mxu0 %v5550_v17  ;;  %v329_v17 = vld [vmem:[%s5852_s22 + $0x168] sm:$0xff]  ;;  %v368_v19 = vpack.c.bf16 %v326_v16, %v324_v15  ;;  %v370_v25 = vpack.c.bf16 %v330_v22, %v328_v21  ;;  %v5552_v27 = vld [vmem:[%s6996_s3 + $0x20] sm:$0xff]   ;;  %724 = vst.msk [vmem:[#allocation2 + $0x90] sm:$0x1] %vm718_vm1, %v5728_v33  ;;  %725 = vst.msk [vmem:[#allocation2 + $0xa8] sm:$0x1] %vm718_vm1, %v5728_v33 }
  0x29   : > { %v332_v28 = vld [vmem:[%s5852_s22 + $0x180] sm:$0xff]  ;;  %726 = vst.msk [vmem:[#allocation2 + $0xc0] sm:$0x1] %vm718_vm1, %v5728_v33  ;;  %727 = vst.msk [vmem:[#allocation2 + $0xd8] sm:$0x1] %vm718_vm1, %v5728_v33  ;;  %v338_v38 = vld [vmem:[%s5852_s22 + $0x1b0] sm:$0xff] }
  0x2a   : > { %728 = vst.msk [vmem:[#allocation2 + $0xf0] sm:$0x1] %vm718_vm1, %v5728_v33  ;;  %729 = vst.msk [vmem:[#allocation2 + $0x108] sm:$0x1] %vm718_vm1, %v5728_v33  ;;  %v336_v37 = vld [vmem:[%s5852_s22 + $0x1a0] sm:$0xff]  ;;  %v5555_v39 = vld [vmem:[%s6996_s3 + $0x38] sm:$0xff]  }
  0x2b   : > { %4592 = vmatpush3.bf16.msra.mxu0 %v5551_v18  ;;  %v331_v18 = vld [vmem:[%s5852_s22 + $0x178] sm:$0xff]  ;;  %730 = vst.msk [vmem:[#allocation2 + $0x120] sm:$0x1] %vm718_vm1, %v5728_v33  ;;  %731 = vst.msk [vmem:[#allocation2 + $0x138] sm:$0x1] %vm718_vm1, %v5728_v33  ;;  %v341_v40 = vld [vmem:[%s5852_s22 + $0x1c8] sm:$0xff] }
  0x2c   : > { %v371_v20 = vpack.c.bf16 %v331_v18, %v329_v17  ;;  %4869 = vmatprep.subr.bf16.mxu0 %v5552_v27  ;;  %732 = vst.msk [vmem:[#allocation2 + $0x150] sm:$0x1] %vm718_vm1, %v5728_v33  ;;  %733 = vst.msk [vmem:[#allocation2 + $0x168] sm:$0x1] %vm718_vm1, %v5728_v33  ;;  %v340_v44 = vld [vmem:[%s5852_s22 + $0x1c0] sm:$0xff]  ;;  %v342_v45 = vld [vmem:[%s5852_s22 + $0x1d0] sm:$0xff] }
  0x2d   : > { %734 = vst.msk [vmem:[#allocation2 + $0x180] sm:$0x1] %vm718_vm1, %v5728_v33  ;;  %735 = vst.msk [vmem:[#allocation2 + $0x29] sm:$0x1] %vm718_vm1, %v5728_v33  ;;  %v345_v46 = vld [vmem:[%s5852_s22 + $0x1e8] sm:$0xff]  ;;  %v344_v50 = vld [vmem:[%s5852_s22 + $0x1e0] sm:$0xff] }
  0x2e   : > { %548 = vmatmul.mubr.bf16.vlgmr.msra.gmra.mrb[0].mxu0 %v348_v23  ;;  %v333_v23 = vld [vmem:[%s5852_s22 + $0x188] sm:$0xff]  ;;  %736 = vst.msk [vmem:[#allocation2 + $0x41] sm:$0x1] %vm718_vm1, %v5728_v33  ;;  %737 = vst.msk [vmem:[#allocation2 + $0x59] sm:$0x1] %vm718_vm1, %v5728_v33  ;;  %v346_v51 = vld [vmem:[%s5852_s22 + $0x1f0] sm:$0xff] }
  0x2f   : > { %555 = vmatprep.mubr.bf16.mxu0 %v351_v24  ;;  %v335_v24 = vld [vmem:[%s5852_s22 + $0x198] sm:$0xff]  ;;  %4870 = vmatpush3.bf16.msra.mxu0 %v5552_v27  ;;  %738 = vst.msk [vmem:[#allocation2 + $0x71] sm:$0x1] %vm718_vm1, %v5728_v33  ;;  %739 = vst.msk [vmem:[#allocation2 + $0x89] sm:$0x1] %vm718_vm1, %v5728_v33  ;;  %v839_v52 = vld [vmem:[#allocation2 + $0x1] sm:$0xff] }
  0x30   : > { %v373_v26 = vpack.c.bf16 %v335_v24, %v333_v23  ;;  %741 = vst.msk [vmem:[#allocation2 + $0xb9] sm:$0x1] %vm718_vm1, %v5728_v33  ;;  %742 = vst.msk [vmem:[#allocation2 + $0xd1] sm:$0x1] %vm718_vm1, %v5728_v33  ;;  %v5993_v56 = vld [vmem:[%s6996_s3 + $0x40] sm:$0xff]   ;;  %v6000_v57 = vld [vmem:[%s6996_s3 + $0x48] sm:$0xff]  }
  0x31   : > { %743 = vst.msk [vmem:[#allocation2 + $0xe9] sm:$0x1] %vm718_vm1, %v5728_v33  ;;  %744 = vst.msk [vmem:[#allocation2 + $0x101] sm:$0x1] %vm718_vm1, %v5728_v33  ;;  %5229 = vmatprep.subr.bf16.mxu1 %v5993_v56  ;;  %v6007_v58 = vld [vmem:[%s6996_s3 + $0x50] sm:$0xff]   ;;  %v5563_v61 = vld [vmem:[%s6996_s3] sm:$0xff]  }
  0x32   : > { %745 = vst.msk [vmem:[#allocation2 + $0x119] sm:$0x1] %vm718_vm1, %v5728_v33  ;;  %746 = vst.msk [vmem:[#allocation2 + $0x131] sm:$0x1] %vm718_vm1, %v5728_v33  ;;  %5233 = vmatpush3.bf16.msra.mxu1 %v5993_v56  ;;  %v6030_v63 = vld [vmem:[%s6995_s2] ss:$0 sm:$0xff] }
  0x33   : > { %747 = vst.msk [vmem:[#allocation2 + $0x149] sm:$0x1] %vm718_vm1, %v5728_v33  ;;  %748 = vst.msk [vmem:[#allocation2 + $0x161] sm:$0x1] %vm718_vm1, %v5728_v33  ;;  %5230 = vmatprep.subr.bf16.mxu1 %v6000_v57 }
  0x34   : > { %749 = vst.msk [vmem:[#allocation2 + $0x179] sm:$0x1] %vm718_vm1, %v5728_v33  ;;  %750 = vst.msk [vmem:[#allocation2 + $0x191] sm:$0x1] %vm718_vm1, %v5728_v33 }
  0x35   : > { %712 = vst.msk [vmem:[#allocation2 + $0x10] sm:$0x3] %vm711_vm2, %v5728_v33  ;;  %716 = vst.msk [vmem:[#allocation2 + $0x1a8] sm:$0x3] %vm711_vm2, %v5728_v33 }
  0x36   : > { %556 = vmatmul.mubr.bf16.gmra.mrb[4].mxu0 %v350_v29  ;;  %v334_v29 = vld [vmem:[%s5852_s22 + $0x190] sm:$0xff]  ;;  %5234 = vmatpush3.bf16.msra.mxu1 %v6000_v57 }
  0x37   : > { %563 = vmatprep.mubr.bf16.mxu0 %v353_v30  ;;  %v5553_v30 = vld [vmem:[%s6996_s3 + $0x28] sm:$0xff]   ;;  %v372_v34 = vpack.c.bf16 %v334_v29, %v332_v28  ;;  %5231 = vmatprep.subr.bf16.mxu1 %v6007_v58 }
  0x38   : > { %4871 = vmatprep.subr.bf16.mxu0 %v5553_v30 }
  0x39   : > { %4872 = vmatpush3.bf16.msra.mxu0 %v5553_v30 }
  0x3a   : > { %5235 = vmatpush3.bf16.msra.mxu1 %v6007_v58 }
  0x3e   : > { %564 = vmatmul.mubr.bf16.gmra.mrb[8].mxu0 %v352_v35  ;;  %v375_v35 = vpack.c.bf16 %v339_v32, %v337_v31  ;;  %v5566_v32 = vld [vmem:[%s6996_s3 + $0x10] sm:$0xff]  }
  0x3f   : > { %571 = vmatprep.mubr.bf16.mxu0 %v355_v36  ;;  %v5554_v36 = vld [vmem:[%s6996_s3 + $0x30] sm:$0xff]  }
  0x40   : > { %4873 = vmatprep.subr.bf16.mxu0 %v5554_v36 }
  0x41   : > { %4874 = vmatpush3.bf16.msra.mxu0 %v5554_v36 }
  0x42   : > { %4875 = vmatprep.subr.bf16.mxu0 %v5555_v39 }
  0x45   : > { %4876 = vmatpush3.bf16.msra.mxu0 %v5555_v39 }
  0x46   : > { %572 = vmatmul.mubr.bf16.gmra.mrb[12].mxu0 %v354_v41  ;;  %v343_v41 = vld [vmem:[%s5852_s22 + $0x1d8] sm:$0xff]  ;;  %4909 = vmatprep.subr.bf16.mxu0 %v5563_v61 }
  0x47   : > { %579 = vmatprep.mubr.bf16.mxu0 %v357_v42  ;;  %v374_v42 = vpack.c.bf16 %v338_v38, %v336_v37  ;;  %v377_v43 = vpack.c.bf16 %v343_v41, %v341_v40  ;;  %v5567_v41 = vld [vmem:[%s6996_s3 + $0x18] sm:$0xff]  }
  0x4e   : > { %580 = vmatmul.mubr.bf16.gmra.mrb[16].mxu0 %v356_v47  ;;  %v347_v47 = vld [vmem:[%s5852_s22 + $0x1f8] sm:$0xff] }
  0x4f   : > { %587 = vmatprep.mubr.bf16.mxu0 %v359_v48  ;;  %v376_v48 = vpack.c.bf16 %v342_v45, %v340_v44  ;;  %v379_v49 = vpack.c.bf16 %v347_v47, %v345_v46 }
  0x56   : > { %588 = vmatmul.mubr.bf16.gmra.mrb[20].mxu0 %v358_v53  ;;  %v840_v53 = vld [vmem:[#allocation2 + $0x9] sm:$0xff] }
  0x57   : > { %595 = vmatprep.mubr.bf16.mxu0 %v361_v54  ;;  %v378_v54 = vpack.c.bf16 %v346_v51, %v344_v50  ;;  %v871_v55 = vpack.c.bf16 %v840_v53, %v839_v52 }
  0x5e   : > { %596 = vmatmul.mubr.bf16.gmra.mrb[24].mxu0 %v360_v59  ;;  %v6014_v59 = vld [vmem:[%s6996_s3 + $0x58] sm:$0xff]  }
  0x5f   : > { %603 = vmatprep.mubr.bf16.mxu0 %v363_v60  ;;  %5232 = vmatprep.subr.bf16.mxu1 %v6014_v59  ;;  %v6021_v60 = vld [vmem:[%s6996_s3 + $0x60] sm:$0xff]  }
  0x60   : > { %5236 = vmatpush3.bf16.msra.mxu1 %v6014_v59 }
  0x61   : > { %4989 = vmatprep.subr.bf16.mxu1 %v6021_v60 }
  0x66   : > { %604 = vmatmul.mubr.bf16.gmra.mrb[28].mxu0 %v362_v1 }
  0x67   : > { %611 = vmatprep.mubr.bf16.mxu0 %v365_v2 }
  0x6e   : > { %612 = vmatmul.mubr.bf16.gmra.mrb[32].mxu0 %v364_v7 }
  0x6f   : > { %619 = vmatprep.mubr.bf16.mxu0 %v367_v8 }
  0x76   : > { %620 = vmatmul.mubr.bf16.gmra.mrb[36].mxu0 %v366_v13 }
  0x77   : > { %627 = vmatprep.mubr.bf16.mxu0 %v369_v14 }
  0x7e   : > { %628 = vmatmul.mubr.bf16.gmra.mrb[40].mxu0 %v368_v19 }
  0x7f   : > { %635 = vmatprep.mubr.bf16.mxu0 %v371_v20 }
  0x86   : > { %636 = vmatmul.mubr.bf16.gmra.mrb[44].mxu0 %v370_v25 }
  0x87   : > { %643 = vmatprep.mubr.bf16.mxu0 %v373_v26  ;;  %v5564_v26 = vld [vmem:[%s6996_s3 + $0x8] sm:$0xff]  }
  0x8e   : > { %644 = vmatmul.mubr.bf16.gmra.mrb[48].mxu0 %v372_v34 }
  0x8f   : > { %651 = vmatprep.mubr.bf16.mxu0 %v375_v35 }
  0x96   : > { %652 = vmatmul.mubr.bf16.gmra.mrb[52].mxu0 %v374_v42 }
  0x97   : > { %659 = vmatprep.mubr.bf16.mxu0 %v377_v43 }
  0x9e   : > { %660 = vmatmul.mubr.bf16.gmra.mrb[56].mxu0 %v376_v48 }
  0x9f   : > { %667 = vmatprep.mubr.bf16.mxu0 %v379_v49 }
  0xa6   : > { %668 = vmatmul.mubr.bf16.gmra.mrb[60].mxu0 %v378_v54 }
  0xa7   : > { %4877 = vmatprep.mubr.msk.bf16.mxu0 %vm708_vm0, %v871_v55 }
 0x101   : > { %v4593_v62 = vpop.f32.mrb[0].mxu0 }
 0x102   : > { %v4594_v0 = vpop.f32.mrb[1].mxu0 }
 0x103   : > { %v4595_v1 = vadd.f32 %v4594_v0, %v4593_v62  ;;  %v4596_v2 = vpop.f32.mrb[2].mxu0 }
 0x104   : > { %v4597_v3 = vpop.f32.mrb[3].mxu0 }
 0x105   : > { %v550_v4 = vadd.f32 %v4595_v1, %v6030_v63  ;;  %v4598_v5 = vadd.f32 %v4597_v3, %v4596_v2 }
 0x107   : > { %v676_v6 = vmax.f32 %v550_v4, 0.0  ;;  %v553_v7 = vadd.f32 %v4598_v5, %v6030_v63 }
 0x109   : > { %751 = vst.msk [vmem:[#allocation2 + $0x19] sm:$0xff] %vm708_vm0, %v676_v6  ;;  %v677_v8 = vmax.f32 %v553_v7, 0.0  ;;  %v4599_v9 = vpop.f32.mrb[4].mxu0 }
 0x10a   : > { %v4600_v10 = vpop.f32.mrb[5].mxu0 }
 0x10b   : > { %752 = vst.msk [vmem:[#allocation2 + $0x21] sm:$0xff] %vm708_vm0, %v677_v8  ;;  %v4601_v11 = vadd.f32 %v4600_v10, %v4599_v9  ;;  %v4602_v12 = vpop.f32.mrb[6].mxu0 }
 0x10c   : > { %v4603_v13 = vpop.f32.mrb[7].mxu0 }
 0x10d   : > { %v558_v14 = vadd.f32 %v4601_v11, %v6030_v63  ;;  %v4604_v15 = vadd.f32 %v4603_v13, %v4602_v12 }
 0x10f   : > { %v678_v16 = vmax.f32 %v558_v14, 0.0  ;;  %v561_v17 = vadd.f32 %v4604_v15, %v6030_v63 }
 0x110   : > { %v841_v21 = vld [vmem:[#allocation2 + $0x19] sm:$0xff] }
 0x111   : > { %753 = vst.msk [vmem:[#allocation2 + $0x31] sm:$0xff] %vm708_vm0, %v678_v16  ;;  %v679_v18 = vmax.f32 %v561_v17, 0.0  ;;  %v4605_v19 = vpop.f32.mrb[8].mxu0 }
 0x112   : > { %v4606_v20 = vpop.f32.mrb[9].mxu0  ;;  %v842_v22 = vld [vmem:[#allocation2 + $0x21] sm:$0xff] }
 0x113   : > { %754 = vst.msk [vmem:[#allocation2 + $0x39] sm:$0xff] %vm708_vm0, %v679_v18  ;;  %v4607_v23 = vadd.f32 %v4606_v20, %v4605_v19  ;;  %v4608_v24 = vpop.f32.mrb[10].mxu0  ;;  %v6040_v25 = vpack.c.bf16 %v842_v22, %v841_v21 }
 0x114   : > { %v4609_v27 = vpop.f32.mrb[11].mxu0 }
 0x115   : > { %v566_v28 = vadd.f32 %v4607_v23, %v6030_v63  ;;  %v4610_v29 = vadd.f32 %v4609_v27, %v4608_v24  ;;  %4878 = vmatmul.mubr.msk.bf16.vlgmr.msra.gmra.mrb[64].mxu0 %vm708_vm0, %v6040_v25 }
 0x116   : > { %4910 = vmatpush3.bf16.msra.mxu0 %v5563_v61 }
 0x117   : > { %v680_v30 = vmax.f32 %v566_v28, 0.0  ;;  %v569_v31 = vadd.f32 %v4610_v29, %v6030_v63  ;;  %4911 = vmatprep.subr.bf16.mxu0 %v5564_v26 }
 0x118   : > { %v843_v36 = vld [vmem:[#allocation2 + $0x31] sm:$0xff] }
 0x119   : > { %755 = vst.msk [vmem:[#allocation2 + $0x49] sm:$0xff] %vm708_vm0, %v680_v30  ;;  %v681_v33 = vmax.f32 %v569_v31, 0.0  ;;  %v4611_v34 = vpop.f32.mrb[12].mxu0 }
 0x11a   : > { %v4612_v35 = vpop.f32.mrb[13].mxu0  ;;  %v844_v37 = vld [vmem:[#allocation2 + $0x39] sm:$0xff]  ;;  %4912 = vmatpush3.bf16.msra.mxu0 %v5564_v26 }
 0x11b   : > { %756 = vst.msk [vmem:[#allocation2 + $0x51] sm:$0xff] %vm708_vm0, %v681_v33  ;;  %v4613_v38 = vadd.f32 %v4612_v35, %v4611_v34  ;;  %v4614_v39 = vpop.f32.mrb[14].mxu0  ;;  %v6054_v40 = vpack.c.bf16 %v844_v37, %v843_v36  ;;  %4913 = vmatprep.subr.bf16.mxu0 %v5566_v32 }
 0x11c   : > { %v4615_v42 = vpop.f32.mrb[15].mxu0 }
 0x11d   : > { %v574_v43 = vadd.f32 %v4613_v38, %v6030_v63  ;;  %v4616_v44 = vadd.f32 %v4615_v42, %v4614_v39  ;;  %4881 = vmatprep.mubr.msk.bf16.mxu0 %vm708_vm0, %v6054_v40 }
 0x11e   : > { %4914 = vmatpush3.bf16.msra.mxu0 %v5566_v32 }
 0x11f   : > { %v682_v45 = vmax.f32 %v574_v43, 0.0  ;;  %v577_v46 = vadd.f32 %v4616_v44, %v6030_v63  ;;  %4915 = vmatprep.subr.bf16.mxu0 %v5567_v41 }
 0x120   : > { %v845_v50 = vld [vmem:[#allocation2 + $0x49] sm:$0xff] }
 0x121   : > { %757 = vst.msk [vmem:[#allocation2 + $0x61] sm:$0xff] %vm708_vm0, %v682_v45  ;;  %v683_v47 = vmax.f32 %v577_v46, 0.0  ;;  %v4617_v48 = vpop.f32.mrb[16].mxu0 }
 0x122   : > { %v4618_v49 = vpop.f32.mrb[17].mxu0  ;;  %v846_v51 = vld [vmem:[#allocation2 + $0x51] sm:$0xff]  ;;  %4916 = vmatpush3.bf16.msra.mxu0 %v5567_v41 }
 0x123   : > { %758 = vst.msk [vmem:[#allocation2 + $0x69] sm:$0xff] %vm708_vm0, %v683_v47  ;;  %v4619_v52 = vadd.f32 %v4618_v49, %v4617_v48  ;;  %v4620_v53 = vpop.f32.mrb[18].mxu0  ;;  %v6065_v54 = vpack.c.bf16 %v846_v51, %v845_v50  ;;  %4949 = vmatprep.subr.bf16.mxu0 %v5993_v56 }
 0x124   : > { %v4621_v55 = vpop.f32.mrb[19].mxu0 }
 0x125   : > { %v582_v61 = vadd.f32 %v4619_v52, %v6030_v63  ;;  %v4622_v62 = vadd.f32 %v4621_v55, %v4620_v53  ;;  %4882 = vmatmul.mubr.msk.bf16.gmra.mrb[68].mxu0 %vm708_vm0, %v6065_v54 }
 0x127   : > { %v684_v0 = vmax.f32 %v582_v61, 0.0  ;;  %v585_v1 = vadd.f32 %v4622_v62, %v6030_v63 }
 0x128   : > { %v847_v5 = vld [vmem:[#allocation2 + $0x61] sm:$0xff] }
 0x129   : > { %759 = vst.msk [vmem:[#allocation2 + $0x79] sm:$0xff] %vm708_vm0, %v684_v0  ;;  %v685_v2 = vmax.f32 %v585_v1, 0.0  ;;  %v4623_v3 = vpop.f32.mrb[20].mxu0  ;;  %v5561_v0 = vld [vmem:[%s6996_s3 + $0x68] sm:$0xff]  }
 0x12a   : > { %v4624_v4 = vpop.f32.mrb[21].mxu0  ;;  %v848_v6 = vld [vmem:[#allocation2 + $0x69] sm:$0xff] }
 0x12b   : > { %760 = vst.msk [vmem:[#allocation2 + $0x81] sm:$0xff] %vm708_vm0, %v685_v2  ;;  %v4625_v7 = vadd.f32 %v4624_v4, %v4623_v3  ;;  %v4626_v8 = vpop.f32.mrb[22].mxu0  ;;  %v6074_v9 = vpack.c.bf16 %v848_v6, %v847_v5  ;;  %v5562_v6 = vld [vmem:[%s6996_s3 + $0x70] sm:$0xff]  }
 0x12c   : > { %v4627_v10 = vpop.f32.mrb[23].mxu0 }
 0x12d   : > { %v590_v11 = vadd.f32 %v4625_v7, %v6030_v63  ;;  %v4628_v12 = vadd.f32 %v4627_v10, %v4626_v8  ;;  %4885 = vmatprep.mubr.msk.bf16.mxu0 %vm708_vm0, %v6074_v9 }
 0x12f   : > { %v686_v13 = vmax.f32 %v590_v11, 0.0  ;;  %v593_v14 = vadd.f32 %v4628_v12, %v6030_v63 }
 0x130   : > { %v849_v18 = vld [vmem:[#allocation2 + $0x79] sm:$0xff] }
 0x131   : > { %761 = vst.msk [vmem:[#allocation2 + $0x91] sm:$0xff] %vm708_vm0, %v686_v13  ;;  %v687_v15 = vmax.f32 %v593_v14, 0.0  ;;  %v4629_v16 = vpop.f32.mrb[24].mxu0 }
 0x132   : > { %v4630_v17 = vpop.f32.mrb[25].mxu0  ;;  %v850_v19 = vld [vmem:[#allocation2 + $0x81] sm:$0xff] }
 0x133   : > { %762 = vst.msk [vmem:[#allocation2 + $0x99] sm:$0xff] %vm708_vm0, %v687_v15  ;;  %v4631_v20 = vadd.f32 %v4630_v17, %v4629_v16  ;;  %v4632_v21 = vpop.f32.mrb[26].mxu0  ;;  %v6082_v22 = vpack.c.bf16 %v850_v19, %v849_v18  ;;  %v5565_v18 = vld [vmem:[%s6996_s3 + $0x78] sm:$0xff]  }
 0x134   : > { %v4633_v23 = vpop.f32.mrb[27].mxu0 }
 0x135   : > { %v598_v24 = vadd.f32 %v4631_v20, %v6030_v63  ;;  %v4634_v26 = vadd.f32 %v4633_v23, %v4632_v21  ;;  %4886 = vmatmul.mubr.msk.bf16.gmra.mrb[72].mxu0 %vm708_vm0, %v6082_v22 }
 0x137   : > { %v688_v27 = vmax.f32 %v598_v24, 0.0  ;;  %v601_v28 = vadd.f32 %v4634_v26, %v6030_v63  ;;  %v6134_v26 = vld [vmem:[%s6996_s3 + $0x80] sm:$0xff]  }
 0x138   : > { %v851_v31 = vld [vmem:[#allocation2 + $0x91] sm:$0xff] }
 0x139   : > { %763 = vst.msk [vmem:[#allocation2 + $0xa9] sm:$0xff] %vm708_vm0, %v688_v27  ;;  %v689_v29 = vmax.f32 %v601_v28, 0.0  ;;  %v4635_v30 = vpop.f32.mrb[28].mxu0 }
 0x13a   : > { %v4636_v32 = vpop.f32.mrb[29].mxu0  ;;  %v852_v33 = vld [vmem:[#allocation2 + $0x99] sm:$0xff] }
 0x13b   : > { %v1374_v34 = vld [vmem:[#allocation2 + $0x92] sm:$0xff]  ;;  %v1375_v35 = vld [vmem:[#allocation2 + $0x9a] sm:$0xff]  ;;  %764 = vst.msk [vmem:[#allocation2 + $0xb1] sm:$0xff] %vm708_vm0, %v689_v29  ;;  %v4637_v36 = vadd.f32 %v4636_v32, %v4635_v30  ;;  %v4638_v37 = vpop.f32.mrb[30].mxu0  ;;  %v6090_v38 = vpack.c.bf16 %v852_v33, %v851_v31 }
 0x13c   : > { %v1400_v39 = vpack.c.bf16 %v1375_v35, %v1374_v34  ;;  %v4639_v41 = vpop.f32.mrb[31].mxu0 }
 0x13d   : > { %v606_v42 = vadd.f32 %v4637_v36, %v6030_v63  ;;  %v4640_v43 = vadd.f32 %v4639_v41, %v4638_v37  ;;  %4889 = vmatprep.mubr.msk.bf16.mxu0 %vm708_vm0, %v6090_v38 }
 0x13e   : > { %4969 = vmatprep.mubr.msk.bf16.mxu1 %vm708_vm0, %v1400_v39 }
 0x13f   : > { %v690_v44 = vmax.f32 %v606_v42, 0.0  ;;  %v609_v45 = vadd.f32 %v4640_v43, %v6030_v63 }
 0x140   : > { %v853_v48 = vld [vmem:[#allocation2 + $0xa9] sm:$0xff] }
 0x141   : > { %765 = vst.msk [vmem:[#allocation2 + $0xc1] sm:$0xff] %vm708_vm0, %v690_v44  ;;  %v691_v46 = vmax.f32 %v609_v45, 0.0  ;;  %v4641_v47 = vpop.f32.mrb[32].mxu0 }
 0x142   : > { %v4642_v49 = vpop.f32.mrb[33].mxu0  ;;  %v854_v50 = vld [vmem:[#allocation2 + $0xb1] sm:$0xff] }
 0x143   : > { %v1376_v51 = vld [vmem:[#allocation2 + $0xaa] sm:$0xff]  ;;  %v1377_v52 = vld [vmem:[#allocation2 + $0xb2] sm:$0xff]  ;;  %766 = vst.msk [vmem:[#allocation2 + $0xc9] sm:$0xff] %vm708_vm0, %v691_v46  ;;  %v4643_v53 = vadd.f32 %v4642_v49, %v4641_v47  ;;  %v4644_v55 = vpop.f32.mrb[34].mxu0  ;;  %v6099_v61 = vpack.c.bf16 %v854_v50, %v853_v48 }
 0x144   : > { %v6101_v62 = vpack.c.bf16 %v1377_v52, %v1376_v51  ;;  %v4645_v1 = vpop.f32.mrb[35].mxu0 }
 0x145   : > { %v614_v2 = vadd.f32 %v4643_v53, %v6030_v63  ;;  %v4646_v3 = vadd.f32 %v4645_v1, %v4644_v55  ;;  %4890 = vmatmul.mubr.msk.bf16.gmra.mrb[76].mxu0 %vm708_vm0, %v6099_v61 }
 0x146   : > { %4970 = vmatmul.mubr.msk.bf16.vlgmr.msra.gmra.mrb[0].mxu1 %vm708_vm0, %v6101_v62 }
 0x147   : > { %4990 = vmatpush3.bf16.msra.mxu1 %v6021_v60  ;;  %v692_v4 = vmax.f32 %v614_v2, 0.0  ;;  %v617_v5 = vadd.f32 %v4646_v3, %v6030_v63 }
 0x148   : > { %4991 = vmatprep.subr.bf16.mxu1 %v5561_v0  ;;  %v855_v10 = vld [vmem:[#allocation2 + $0xc1] sm:$0xff] }
 0x149   : > { %767 = vst.msk [vmem:[#allocation2 + $0xd9] sm:$0xff] %vm708_vm0, %v692_v4  ;;  %v693_v7 = vmax.f32 %v617_v5, 0.0  ;;  %v4647_v8 = vpop.f32.mrb[36].mxu0 }
 0x14a   : > { %v4648_v11 = vpop.f32.mrb[37].mxu0  ;;  %v856_v12 = vld [vmem:[#allocation2 + $0xc9] sm:$0xff] }
 0x14b   : > { %v1378_v13 = vld [vmem:[#allocation2 + $0xc2] sm:$0xff]  ;;  %v1379_v14 = vld [vmem:[#allocation2 + $0xca] sm:$0xff]  ;;  %4992 = vmatpush3.bf16.msra.mxu1 %v5561_v0  ;;  %768 = vst.msk [vmem:[#allocation2 + $0xe1] sm:$0xff] %vm708_vm0, %v693_v7  ;;  %v4649_v60 = vadd.f32 %v4648_v11, %v4647_v8  ;;  %v4650_v15 = vpop.f32.mrb[38].mxu0  ;;  %v6118_v16 = vpack.c.bf16 %v856_v12, %v855_v10 }
 0x14c   : > { %v6120_v17 = vpack.c.bf16 %v1379_v14, %v1378_v13  ;;  %4993 = vmatprep.subr.bf16.mxu1 %v5562_v6  ;;  %v4651_v19 = vpop.f32.mrb[39].mxu0 }
 0x14d   : > { %v622_v20 = vadd.f32 %v4649_v60, %v6030_v63  ;;  %v4652_v21 = vadd.f32 %v4651_v19, %v4650_v15  ;;  %4893 = vmatprep.mubr.msk.bf16.mxu0 %vm708_vm0, %v6118_v16 }
 0x14e   : > { %4973 = vmatprep.mubr.msk.bf16.mxu1 %vm708_vm0, %v6120_v17 }
 0x14f   : > { %4994 = vmatpush3.bf16.msra.mxu1 %v5562_v6  ;;  %v694_v23 = vmax.f32 %v622_v20, 0.0  ;;  %v625_v24 = vadd.f32 %v4652_v21, %v6030_v63 }
 0x150   : > { %4995 = vmatprep.subr.bf16.mxu1 %v5565_v18  ;;  %v857_v29 = vld [vmem:[#allocation2 + $0xd9] sm:$0xff] }
 0x151   : > { %769 = vst.msk [vmem:[#allocation2 + $0xf1] sm:$0xff] %vm708_vm0, %v694_v23  ;;  %v695_v27 = vmax.f32 %v625_v24, 0.0  ;;  %v4653_v28 = vpop.f32.mrb[40].mxu0 }
 0x152   : > { %v4654_v30 = vpop.f32.mrb[41].mxu0  ;;  %v858_v31 = vld [vmem:[#allocation2 + $0xe1] sm:$0xff] }
 0x153   : > { %v1380_v32 = vld [vmem:[#allocation2 + $0xda] sm:$0xff]  ;;  %v1381_v33 = vld [vmem:[#allocation2 + $0xe2] sm:$0xff]  ;;  %4996 = vmatpush3.bf16.msra.mxu1 %v5565_v18  ;;  %770 = vst.msk [vmem:[#allocation2 + $0xf9] sm:$0xff] %vm708_vm0, %v695_v27  ;;  %v4655_v34 = vadd.f32 %v4654_v30, %v4653_v28  ;;  %v4656_v35 = vpop.f32.mrb[42].mxu0  ;;  %v6138_v36 = vpack.c.bf16 %v858_v31, %v857_v29 }
 0x154   : > { %v6140_v37 = vpack.c.bf16 %v1381_v33, %v1380_v32  ;;  %5029 = vmatprep.subr.bf16.mxu1 %v6134_v26  ;;  %v4657_v39 = vpop.f32.mrb[43].mxu0 }
 0x155   : > { %v630_v41 = vadd.f32 %v4655_v34, %v6030_v63  ;;  %v4658_v42 = vadd.f32 %v4657_v39, %v4656_v35  ;;  %4894 = vmatmul.mubr.msk.bf16.gmra.mrb[80].mxu0 %vm708_vm0, %v6138_v36 }
 0x156   : > { %4974 = vmatmul.mubr.msk.bf16.gmra.mrb[4].mxu1 %vm708_vm0, %v6140_v37 }
 0x157   : > { %v696_v43 = vmax.f32 %v630_v41, 0.0  ;;  %v633_v44 = vadd.f32 %v4658_v42, %v6030_v63 }
 0x158   : > { %v859_v47 = vld [vmem:[#allocation2 + $0xf1] sm:$0xff] }
 0x159   : > { %771 = vst.msk [vmem:[#allocation2 + $0x109] sm:$0xff] %vm708_vm0, %v696_v43  ;;  %v697_v45 = vmax.f32 %v633_v44, 0.0  ;;  %v4659_v46 = vpop.f32.mrb[44].mxu0 }
 0x15a   : > { %v4660_v48 = vpop.f32.mrb[45].mxu0  ;;  %v860_v49 = vld [vmem:[#allocation2 + $0xf9] sm:$0xff] }
 0x15b   : > { %v1382_v50 = vld [vmem:[#allocation2 + $0xf2] sm:$0xff]  ;;  %v1383_v51 = vld [vmem:[#allocation2 + $0xfa] sm:$0xff]  ;;  %772 = vst.msk [vmem:[#allocation2 + $0x111] sm:$0xff] %vm708_vm0, %v697_v45  ;;  %v4661_v52 = vadd.f32 %v4660_v48, %v4659_v46  ;;  %v4662_v53 = vpop.f32.mrb[46].mxu0  ;;  %v6151_v55 = vpack.c.bf16 %v860_v49, %v859_v47 }
 0x15c   : > { %v6153_v0 = vpack.c.bf16 %v1383_v51, %v1382_v50  ;;  %v4663_v1 = vpop.f32.mrb[47].mxu0 }
 0x15d   : > { %v638_v2 = vadd.f32 %v4661_v52, %v6030_v63  ;;  %v4664_v3 = vadd.f32 %v4663_v1, %v4662_v53  ;;  %4897 = vmatprep.mubr.msk.bf16.mxu0 %vm708_vm0, %v6151_v55 }
 0x15e   : > { %4977 = vmatprep.mubr.msk.bf16.mxu1 %vm708_vm0, %v6153_v0 }
 0x15f   : > { %v698_v4 = vmax.f32 %v638_v2, 0.0  ;;  %v641_v5 = vadd.f32 %v4664_v3, %v6030_v63 }
 0x160   : > { %v861_v8 = vld [vmem:[#allocation2 + $0x109] sm:$0xff] }
 0x161   : > { %773 = vst.msk [vmem:[#allocation2 + $0x121] sm:$0xff] %vm708_vm0, %v698_v4  ;;  %v699_v6 = vmax.f32 %v641_v5, 0.0  ;;  %v4665_v7 = vpop.f32.mrb[48].mxu0 }
 0x162   : > { %v4666_v10 = vpop.f32.mrb[49].mxu0  ;;  %v862_v11 = vld [vmem:[#allocation2 + $0x111] sm:$0xff] }
 0x163   : > { %v1384_v12 = vld [vmem:[#allocation2 + $0x10a] sm:$0xff]  ;;  %v1385_v13 = vld [vmem:[#allocation2 + $0x112] sm:$0xff]  ;;  %774 = vst.msk [vmem:[#allocation2 + $0x129] sm:$0xff] %vm708_vm0, %v699_v6  ;;  %v4667_v14 = vadd.f32 %v4666_v10, %v4665_v7  ;;  %v4668_v60 = vpop.f32.mrb[50].mxu0  ;;  %v6163_v15 = vpack.c.bf16 %v862_v11, %v861_v8 }
 0x164   : > { %v6165_v18 = vpack.c.bf16 %v1385_v13, %v1384_v12  ;;  %v4669_v19 = vpop.f32.mrb[51].mxu0 }
 0x165   : > { %v646_v20 = vadd.f32 %v4667_v14, %v6030_v63  ;;  %v4670_v21 = vadd.f32 %v4669_v19, %v4668_v60  ;;  %4898 = vmatmul.mubr.msk.bf16.gmra.mrb[84].mxu0 %vm708_vm0, %v6163_v15 }
 0x166   : > { %4978 = vmatmul.mubr.msk.bf16.gmra.mrb[8].mxu1 %vm708_vm0, %v6165_v18 }
 0x167   : > { %v700_v23 = vmax.f32 %v646_v20, 0.0  ;;  %v649_v24 = vadd.f32 %v4670_v21, %v6030_v63 }
 0x168   : > { %v863_v29 = vld [vmem:[#allocation2 + $0x121] sm:$0xff] }
 0x169   : > { %775 = vst.msk [vmem:[#allocation2 + $0x139] sm:$0xff] %vm708_vm0, %v700_v23  ;;  %v701_v27 = vmax.f32 %v649_v24, 0.0  ;;  %v4671_v28 = vpop.f32.mrb[52].mxu0 }
 0x16a   : > { %v4672_v30 = vpop.f32.mrb[53].mxu0  ;;  %v864_v31 = vld [vmem:[#allocation2 + $0x129] sm:$0xff] }
 0x16b   : > { %v1386_v32 = vld [vmem:[#allocation2 + $0x122] sm:$0xff]  ;;  %v1387_v33 = vld [vmem:[#allocation2 + $0x12a] sm:$0xff]  ;;  %776 = vst.msk [vmem:[#allocation2 + $0x141] sm:$0xff] %vm708_vm0, %v701_v27  ;;  %v4673_v34 = vadd.f32 %v4672_v30, %v4671_v28  ;;  %v4674_v35 = vpop.f32.mrb[54].mxu0  ;;  %v6175_v39 = vpack.c.bf16 %v864_v31, %v863_v29 }
 0x16c   : > { %v6177_v41 = vpack.c.bf16 %v1387_v33, %v1386_v32  ;;  %v4675_v42 = vpop.f32.mrb[55].mxu0  ;;  %v783_v31 = vld [vmem:[#allocation2] sm:$0xff]  ;;  %v784_v32 = vld [vmem:[#allocation2 + $0x8] sm:$0xff] }
 0x16d   : > { %v654_v43 = vadd.f32 %v4673_v34, %v6030_v63  ;;  %v4676_v44 = vadd.f32 %v4675_v42, %v4674_v35  ;;  %4901 = vmatprep.mubr.msk.bf16.mxu0 %vm708_vm0, %v6175_v39  ;;  %v1685_v42 = vld [vmem:[#allocation2 + $0x20] sm:$0xff] }
 0x16e   : > { %4981 = vmatprep.mubr.msk.bf16.mxu1 %vm708_vm0, %v6177_v41 }
 0x16f   : > { %v702_v45 = vmax.f32 %v654_v43, 0.0  ;;  %v657_v46 = vadd.f32 %v4676_v44, %v6030_v63 }
 0x170   : > { %v865_v49 = vld [vmem:[#allocation2 + $0x139] sm:$0xff] }
 0x171   : > { %777 = vst.msk [vmem:[#allocation2 + $0x151] sm:$0xff] %vm708_vm0, %v702_v45  ;;  %v703_v47 = vmax.f32 %v657_v46, 0.0  ;;  %v4677_v48 = vpop.f32.mrb[56].mxu0 }
 0x172   : > { %v4678_v50 = vpop.f32.mrb[57].mxu0  ;;  %v866_v51 = vld [vmem:[#allocation2 + $0x141] sm:$0xff] }
 0x173   : > { %v1388_v52 = vld [vmem:[#allocation2 + $0x13a] sm:$0xff]  ;;  %v1389_v53 = vld [vmem:[#allocation2 + $0x142] sm:$0xff]  ;;  %778 = vst.msk [vmem:[#allocation2 + $0x159] sm:$0xff] %vm708_vm0, %v703_v47  ;;  %v4679_v1 = vadd.f32 %v4678_v50, %v4677_v48  ;;  %v4680_v2 = vpop.f32.mrb[58].mxu0  ;;  %v6187_v3 = vpack.c.bf16 %v866_v51, %v865_v49  ;;  %v815_v47 = vpack.c.bf16 %v784_v32, %v783_v31 }
 0x174   : > { %v6189_v4 = vpack.c.bf16 %v1389_v53, %v1388_v52  ;;  %v4681_v5 = vpop.f32.mrb[59].mxu0  ;;  %v1684_v50 = vld [vmem:[#allocation2 + $0x18] sm:$0xff]  ;;  %v1686_v52 = vld [vmem:[#allocation2 + $0x30] sm:$0xff] }
 0x175   : > { %v662_v6 = vadd.f32 %v4679_v1, %v6030_v63  ;;  %v4682_v7 = vadd.f32 %v4681_v5, %v4680_v2  ;;  %4902 = vmatmul.mubr.msk.bf16.gmra.mrb[88].mxu0 %vm708_vm0, %v6187_v3  ;;  %v1716_v51 = vpack.c.bf16 %v1685_v42, %v1684_v50  ;;  %v1689_v53 = vld [vmem:[#allocation2 + $0x50] sm:$0xff]  ;;  %v5569_v2 = vld [vmem:[%s6996_s3 + $0x88] sm:$0xff]   ;;  %v1703_v32 = vld [vmem:[#allocation2 + $0xf8] sm:$0xff] }
 0x176   : > { %4982 = vmatmul.mubr.msk.bf16.gmra.mrb[12].mxu1 %vm708_vm0, %v6189_v4  ;;  %v1688_v5 = vld [vmem:[#allocation2 + $0x48] sm:$0xff]  ;;  %v1708_v50 = vld [vmem:[#allocation2 + $0x138] sm:$0xff] }
 0x177   : > { %v704_v8 = vmax.f32 %v662_v6, 0.0  ;;  %v665_v10 = vadd.f32 %v4682_v7, %v6030_v63  ;;  %v6229_v6 = vpack.c.bf16 %v1689_v53, %v1688_v5  ;;  %v5570_v7 = vld [vmem:[%s6996_s3 + $0x90] sm:$0xff]   ;;  %v1704_v42 = vld [vmem:[#allocation2 + $0x108] sm:$0xff] }
 0x178   : > { %v867_v12 = vld [vmem:[#allocation2 + $0x151] sm:$0xff] }
 0x179   : > { %779 = vst.msk [vmem:[#allocation2 + $0x169] sm:$0xff] %vm708_vm0, %v704_v8  ;;  %v705_v11 = vmax.f32 %v665_v10, 0.0  ;;  %v4683_v13 = vpop.f32.mrb[60].mxu0  ;;  %v1691_v8 = vld [vmem:[#allocation2 + $0x68] sm:$0xff]  ;;  %v1693_v10 = vld [vmem:[#allocation2 + $0x80] sm:$0xff]  ;;  %v1710_v53 = vld [vmem:[#allocation2 + $0x150] sm:$0xff] }
 0x17a   : > { %v868_v14 = vld [vmem:[#allocation2 + $0x159] sm:$0xff]  ;;  %v4684_v20 = vpop.f32.mrb[61].mxu0 }
 0x17b   : > { %v1390_v60 = vld [vmem:[#allocation2 + $0x152] sm:$0xff]  ;;  %v1391_v19 = vld [vmem:[#allocation2 + $0x15a] sm:$0xff]  ;;  %780 = vst.msk [vmem:[#allocation2 + $0x171] sm:$0xff] %vm708_vm0, %v705_v11  ;;  %v6199_v21 = vpack.c.bf16 %v868_v14, %v867_v12  ;;  %v4685_v24 = vadd.f32 %v4684_v20, %v4683_v13  ;;  %v4686_v27 = vpop.f32.mrb[62].mxu0 }
 0x17c   : > { %v6201_v23 = vpack.c.bf16 %v1391_v19, %v1390_v60  ;;  %v4687_v28 = vpop.f32.mrb[63].mxu0  ;;  %v1690_v11 = vld [vmem:[#allocation2 + $0x60] sm:$0xff]  ;;  %v1692_v12 = vld [vmem:[#allocation2 + $0x78] sm:$0xff]  ;;  %v1697_v60 = vld [vmem:[#allocation2 + $0xb0] sm:$0xff] }
 0x17d   : > { %4905 = vmatprep.mubr.msk.bf16.mxu0 %vm708_vm0, %v6199_v21  ;;  %v670_v29 = vadd.f32 %v4685_v24, %v6030_v63  ;;  %v4688_v30 = vadd.f32 %v4687_v28, %v4686_v27  ;;  %v6243_v13 = vpack.c.bf16 %v1693_v10, %v1692_v12  ;;  %v5571_v14 = vld [vmem:[%s6996_s3 + $0x98] sm:$0xff]   ;;  %v1694_v19 = vld [vmem:[#allocation2 + $0x90] sm:$0xff]  ;;  %v1696_v24 = vld [vmem:[#allocation2 + $0xa8] sm:$0xff] }
 0x17e   : > { %4985 = vmatprep.mubr.msk.bf16.mxu1 %vm708_vm0, %v6201_v23  ;;  %v6267_v27 = vpack.c.bf16 %v1697_v60, %v1696_v24  ;;  %v1701_v28 = vld [vmem:[#allocation2 + $0xe0] sm:$0xff]  ;;  %v1363_v10 = vld [vmem:[#allocation2 + $0xa] sm:$0xff]  ;;  %v1366_v24 = vld [vmem:[#allocation2 + $0x32] sm:$0xff] }
 0x17f   : > { %v706_v33 = vmax.f32 %v670_v29, 0.0  ;;  %v673_v34 = vadd.f32 %v4688_v30, %v6030_v63  ;;  %v1687_v63 = vld [vmem:[#allocation2 + $0x38] sm:$0xff]  ;;  %v1698_v29 = vld [vmem:[#allocation2 + $0xc0] sm:$0xff] }
 0x180   : > { %v869_v35 = vld [vmem:[#allocation2 + $0x169] sm:$0xff]  ;;  %v6221_v1 = vpack.c.bf16 %v1687_v63, %v1686_v52  ;;  %v1711_v63 = vld [vmem:[#allocation2 + $0x158] sm:$0xff] }
 0x181   : > { %781 = vst.msk [vmem:[#allocation2 + $0x181] sm:$0xff] %vm708_vm0, %v706_v33  ;;  %v707_v43 = vmax.f32 %v673_v34, 0.0  ;;  %v1705_v33 = vld [vmem:[#allocation2 + $0x110] sm:$0xff]  ;;  %v1712_v5 = vld [vmem:[#allocation2 + $0x168] sm:$0xff]  ;;  %v1364_v60 = vld [vmem:[#allocation2 + $0x1a] sm:$0xff] }
 0x182   : > { %v870_v44 = vld [vmem:[#allocation2 + $0x171] sm:$0xff] }
 0x183   : > { %v1392_v45 = vld [vmem:[#allocation2 + $0x16a] sm:$0xff]  ;;  %v1393_v46 = vld [vmem:[#allocation2 + $0x172] sm:$0xff]  ;;  %v6210_v48 = vpack.c.bf16 %v870_v44, %v869_v35  ;;  %782 = vst.msk [vmem:[#allocation2 + $0x189] sm:$0xff] %vm708_vm0, %v707_v43  ;;  %v6293_v43 = vpack.c.bf16 %v1705_v33, %v1704_v42 }
 0x184   : > { %v6212_v49 = vpack.c.bf16 %v1393_v46, %v1392_v45  ;;  %v1702_v34 = vld [vmem:[#allocation2 + $0xf0] sm:$0xff]  ;;  %v1707_v44 = vld [vmem:[#allocation2 + $0x128] sm:$0xff]  ;;  %v1709_v45 = vld [vmem:[#allocation2 + $0x140] sm:$0xff] }
 0x185   : > { %4906 = vmatmul.mubr.msk.bf16.gmra.mrb[92].mxu0 %vm708_vm0, %v6210_v48  ;;  %v6291_v35 = vpack.c.bf16 %v1703_v32, %v1702_v34  ;;  %v1706_v46 = vld [vmem:[#allocation2 + $0x120] sm:$0xff]  ;;  %v1713_v52 = vld [vmem:[#allocation2 + $0x170] sm:$0xff] }
 0x186   : > { %4986 = vmatmul.mubr.msk.bf16.gmra.mrb[16].mxu1 %vm708_vm0, %v6212_v49  ;;  %4917 = vmatprep.mubr.msk.bf16.mxu0 %vm708_vm0, %v815_v47  ;;  %v6303_v47 = vpack.c.bf16 %v1707_v44, %v1706_v46  ;;  %v1368_v32 = vld [vmem:[#allocation2 + $0x4a] sm:$0xff]  ;;  %v1369_v33 = vld [vmem:[#allocation2 + $0x52] sm:$0xff]  ;;  %v1370_v34 = vld [vmem:[#allocation2 + $0x62] sm:$0xff] }
 0x187   : > { %4997 = vmatprep.mubr.msk.bf16.mxu1 %vm708_vm0, %v1716_v51  ;;  %v1371_v42 = vld [vmem:[#allocation2 + $0x6a] sm:$0xff]  ;;  %v6352_v44 = vpack.c.bf16 %v1369_v33, %v1368_v32  ;;  %v5576_v46 = vld [vmem:[%s6996_s3 + $0xc0] sm:$0xff]  }
 0x188   : > { %v2982_v32 = vld [vmem:[#allocation2 + $0x99] sm:$0xff] }
 0x18a   : > { %v1715_v12 = vld [vmem:[#allocation2 + $0x188] sm:$0xff] }
 0x18d   : > { %4918 = vmatmul.mubr.msk.bf16.vlgmr.msra.gmra.mrb[64].mxu0 %vm708_vm0, %v1716_v51  ;;  %v6305_v51 = vpack.c.bf16 %v1709_v45, %v1708_v50  ;;  %v1373_v45 = vld [vmem:[#allocation2 + $0x82] sm:$0xff] }
 0x18e   : > { %4998 = vmatmul.mubr.msk.bf16.vlgmr.msra.gmra.mrb[20].mxu1 %vm708_vm0, %v6221_v1  ;;  %4921 = vmatprep.mubr.msk.bf16.mxu0 %vm708_vm0, %v6221_v1 }
 0x18f   : > { %5030 = vmatpush3.bf16.msra.mxu1 %v6134_v26  ;;  %5001 = vmatprep.mubr.msk.bf16.mxu1 %vm708_vm0, %v6229_v6  ;;  %v6241_v26 = vpack.c.bf16 %v1691_v8, %v1690_v11  ;;  %v1362_v8 = vld [vmem:[#allocation2 + $0x2] sm:$0xff] }
 0x190   : > { %5031 = vmatprep.subr.bf16.mxu1 %v5569_v2  ;;  %4950 = vmatpush3.bf16.msra.mxu0 %v5993_v56  ;;  %v1695_v56 = vld [vmem:[#allocation2 + $0x98] sm:$0xff]  ;;  %v1714_v11 = vld [vmem:[#allocation2 + $0x180] sm:$0xff] }
 0x191   : > { %4951 = vmatprep.subr.bf16.mxu0 %v6000_v57  ;;  %v6265_v20 = vpack.c.bf16 %v1695_v56, %v1694_v19  ;;  %v6327_v56 = vpack.c.bf16 %v1715_v12, %v1714_v11  ;;  %v1365_v19 = vld [vmem:[#allocation2 + $0x22] sm:$0xff] }
 0x192   : > { %v2975_v11 = vld [vmem:[#allocation2 + $0x49] sm:$0xff] }
 0x193   : > { %5032 = vmatpush3.bf16.msra.mxu1 %v5569_v2  ;;  %v6315_v2 = vpack.c.bf16 %v1711_v63, %v1710_v53  ;;  %v5593_v63 = vld [vmem:[%s6998_s5 + $0x14] ss:$8 sps:$4 sm:$0xff]  }
 0x194   : > { %5033 = vmatprep.subr.bf16.mxu1 %v5570_v7  ;;  %4952 = vmatpush3.bf16.msra.mxu0 %v6000_v57  ;;  %v6262_v57 = vld [vmem:[%s6996_s3 + $0xa0] sm:$0xff]   ;;  %v2976_v53 = vld [vmem:[#allocation2 + $0x51] sm:$0xff] }
 0x195   : > { %4922 = vmatmul.mubr.msk.bf16.gmra.mrb[68].mxu0 %vm708_vm0, %v6229_v6  ;;  %4953 = vmatprep.subr.bf16.mxu0 %v6007_v58 }
 0x196   : > { %5002 = vmatmul.mubr.msk.bf16.gmra.mrb[24].mxu1 %vm708_vm0, %v6241_v26  ;;  %4925 = vmatprep.mubr.msk.bf16.mxu0 %vm708_vm0, %v6241_v26 }
 0x197   : > { %5005 = vmatprep.mubr.msk.bf16.mxu1 %vm708_vm0, %v6243_v13  ;;  %5034 = vmatpush3.bf16.msra.mxu1 %v5570_v7  ;;  %v6317_v7 = vpack.c.bf16 %v1713_v52, %v1712_v5 }
 0x198   : > { %5035 = vmatprep.subr.bf16.mxu1 %v5571_v14  ;;  %4954 = vmatpush3.bf16.msra.mxu0 %v6007_v58  ;;  %v1699_v58 = vld [vmem:[#allocation2 + $0xc8] sm:$0xff] }
 0x199   : > { %4955 = vmatprep.subr.bf16.mxu0 %v6014_v59  ;;  %v6279_v30 = vpack.c.bf16 %v1699_v58, %v1698_v29  ;;  %v1367_v58 = vld [vmem:[#allocation2 + $0x3a] sm:$0xff]  ;;  %v5573_v29 = vld [vmem:[%s6996_s3 + $0xa8] sm:$0xff]  }
 0x19b   : > { %5036 = vmatpush3.bf16.msra.mxu1 %v5571_v14  ;;  %v1394_v14 = vpack.c.bf16 %v1363_v10, %v1362_v8  ;;  %v5596_v8 = vld [vmem:[%s6998_s5 + $0x24] ss:$8 sps:$4 sm:$0xff]  }
 0x19c   : > { %4956 = vmatpush3.bf16.msra.mxu0 %v6014_v59  ;;  %5069 = vmatprep.subr.bf16.mxu1 %v6262_v57  ;;  %v1700_v59 = vld [vmem:[#allocation2 + $0xd8] sm:$0xff] }
 0x19d   : > { %4926 = vmatmul.mubr.msk.bf16.gmra.mrb[72].mxu0 %vm708_vm0, %v6243_v13  ;;  %v6281_v31 = vpack.c.bf16 %v1701_v28, %v1700_v59  ;;  %v1395_v28 = vpack.c.bf16 %v1365_v19, %v1364_v60  ;;  %v6339_v59 = vpack.c.bf16 %v1367_v58, %v1366_v24  ;;  %v5585_v60 = vld [vmem:[%s6996_s3 + $0x108] sm:$0xff]   ;;  %v5586_v58 = vld [vmem:[%s6996_s3 + $0x110] sm:$0xff]  }
 0x19e   : > { %5006 = vmatmul.mubr.msk.bf16.gmra.mrb[28].mxu1 %vm708_vm0, %v6265_v20  ;;  %4929 = vmatprep.mubr.msk.bf16.mxu0 %vm708_vm0, %v6265_v20  ;;  %v5594_v24 = vld [vmem:[%s6998_s5 + $0x20] ss:$8 sps:$4 sm:$0xff]  }
 0x19f   : > { %5009 = vmatprep.mubr.msk.bf16.mxu1 %vm708_vm0, %v6267_v27 }
 0x1a5   : > { %4930 = vmatmul.mubr.msk.bf16.gmra.mrb[76].mxu0 %vm708_vm0, %v6267_v27 }
 0x1a6   : > { %5010 = vmatmul.mubr.msk.bf16.gmra.mrb[0].mxu1 %vm708_vm0, %v6279_v30  ;;  %4933 = vmatprep.mubr.msk.bf16.mxu0 %vm708_vm0, %v6279_v30 }
 0x1a7   : > { %5013 = vmatprep.mubr.msk.bf16.mxu1 %vm708_vm0, %v6281_v31 }
 0x1ad   : > { %4934 = vmatmul.mubr.msk.bf16.gmra.mrb[80].mxu0 %vm708_vm0, %v6281_v31 }
 0x1ae   : > { %5014 = vmatmul.mubr.msk.bf16.gmra.mrb[4].mxu1 %vm708_vm0, %v6291_v35  ;;  %4937 = vmatprep.mubr.msk.bf16.mxu0 %vm708_vm0, %v6291_v35 }
 0x1af   : > { %5017 = vmatprep.mubr.msk.bf16.mxu1 %vm708_vm0, %v6293_v43 }
 0x1b5   : > { %4938 = vmatmul.mubr.msk.bf16.gmra.mrb[84].mxu0 %vm708_vm0, %v6293_v43 }
 0x1b6   : > { %5018 = vmatmul.mubr.msk.bf16.gmra.mrb[8].mxu1 %vm708_vm0, %v6303_v47  ;;  %4941 = vmatprep.mubr.msk.bf16.mxu0 %vm708_vm0, %v6303_v47 }
 0x1b7   : > { %5021 = vmatprep.mubr.msk.bf16.mxu1 %vm708_vm0, %v6305_v51 }
 0x1bd   : > { %4942 = vmatmul.mubr.msk.bf16.gmra.mrb[88].mxu0 %vm708_vm0, %v6305_v51 }
 0x1be   : > { %5022 = vmatmul.mubr.msk.bf16.gmra.mrb[12].mxu1 %vm708_vm0, %v6315_v2  ;;  %4945 = vmatprep.mubr.msk.bf16.mxu0 %vm708_vm0, %v6315_v2 }
 0x1bf   : > { %5025 = vmatprep.mubr.msk.bf16.mxu1 %vm708_vm0, %v6317_v7 }
 0x1c5   : > { %4946 = vmatmul.mubr.msk.bf16.gmra.mrb[92].mxu0 %vm708_vm0, %v6317_v7 }
 0x1c6   : > { %5026 = vmatmul.mubr.msk.bf16.gmra.mrb[16].mxu1 %vm708_vm0, %v6327_v56  ;;  %4957 = vmatprep.mubr.msk.bf16.mxu0 %vm708_vm0, %v1394_v14  ;;  %v3006_v14 = vpack.c.bf16 %v2976_v53, %v2975_v11  ;;  %v2994_v53 = vld [vmem:[#allocation2 + $0x129] sm:$0xff] }
 0x1c7   : > { %5037 = vmatprep.mubr.msk.bf16.mxu1 %vm708_vm0, %v6040_v25  ;;  %v5574_v25 = vld [vmem:[%s6996_s3 + $0xb0] sm:$0xff]  }
 0x1cd   : > { %4958 = vmatmul.mubr.msk.bf16.vlgmr.msra.gmra.mrb[64].mxu0 %vm708_vm0, %v1395_v28 }
 0x1ce   : > { %5038 = vmatmul.mubr.msk.bf16.vlgmr.msra.gmra.mrb[20].mxu1 %vm708_vm0, %v6054_v40  ;;  %4961 = vmatprep.mubr.msk.bf16.mxu0 %vm708_vm0, %v6339_v59  ;;  %v6354_v40 = vpack.c.bf16 %v1371_v42, %v1370_v34  ;;  %v2979_v34 = vld [vmem:[#allocation2 + $0x79] sm:$0xff] }
 0x1cf   : > { %5070 = vmatpush3.bf16.msra.mxu1 %v6262_v57  ;;  %5041 = vmatprep.mubr.msk.bf16.mxu1 %vm708_vm0, %v6065_v54  ;;  %v5575_v57 = vld [vmem:[%s6996_s3 + $0xb8] sm:$0xff]  }
 0x1d0   : > { %5071 = vmatprep.subr.bf16.mxu1 %v5573_v29  ;;  %v1372_v54 = vld [vmem:[#allocation2 + $0x7a] sm:$0xff] }
 0x1d1   : > { %v6370_v50 = vpack.c.bf16 %v1373_v45, %v1372_v54  ;;  %v2981_v54 = vld [vmem:[#allocation2 + $0x91] sm:$0xff] }
 0x1d2   : > { %v5587_v45 = vld [vmem:[%s6996_s3 + $0x118] sm:$0xff]  }
 0x1d3   : > { %5072 = vmatpush3.bf16.msra.mxu1 %v5573_v29  ;;  %v2980_v29 = vld [vmem:[#allocation2 + $0x81] sm:$0xff] }
 0x1d4   : > { %5073 = vmatprep.subr.bf16.mxu1 %v5574_v25 }
 0x1d5   : > { %4962 = vmatmul.mubr.msk.bf16.gmra.mrb[68].mxu0 %vm708_vm0, %v6352_v44 }
 0x1d6   : > { %5042 = vmatmul.mubr.msk.bf16.gmra.mrb[24].mxu1 %vm708_vm0, %v6074_v9  ;;  %4965 = vmatprep.mubr.msk.bf16.mxu0 %vm708_vm0, %v6354_v40  ;;  %v2036_v9 = vld [vmem:[#allocation2 + $0x181] sm:$0xff] }
 0x1d7   : > { %5045 = vmatprep.mubr.msk.bf16.mxu1 %vm708_vm0, %v6082_v22  ;;  %5074 = vmatpush3.bf16.msra.mxu1 %v5574_v25  ;;  %v2037_v22 = vld [vmem:[#allocation2 + $0x189] sm:$0xff] }
 0x1d8   : > { %5075 = vmatprep.subr.bf16.mxu1 %v5575_v57 }
 0x1db   : > { %5076 = vmatpush3.bf16.msra.mxu1 %v5575_v57  ;;  %v3008_v57 = vpack.c.bf16 %v2980_v29, %v2979_v34 }
 0x1dc   : > { %5109 = vmatprep.subr.bf16.mxu1 %v5576_v46 }
 0x1dd   : > { %4966 = vmatmul.mubr.msk.bf16.gmra.mrb[72].mxu0 %vm708_vm0, %v6370_v50 }
 0x1de   : > { %5046 = vmatmul.mubr.msk.bf16.gmra.mrb[28].mxu1 %vm708_vm0, %v6090_v38  ;;  %v6394_v38 = vpack.c.bf16 %v2037_v22, %v2036_v9  ;;  %v2984_v22 = vld [vmem:[#allocation2 + $0xb1] sm:$0xff] }
 0x1df   : > { %5049 = vmatprep.mubr.msk.bf16.mxu1 %vm708_vm0, %v6099_v61  ;;  %v5577_v61 = vld [vmem:[%s6996_s3 + $0xc8] sm:$0xff]  }
 0x1e6   : > { %5050 = vmatmul.mubr.msk.bf16.gmra.mrb[0].mxu1 %vm708_vm0, %v6118_v16  ;;  %v5578_v16 = vld [vmem:[%s6996_s3 + $0xd0] sm:$0xff]  }
 0x1e7   : > { %5053 = vmatprep.mubr.msk.bf16.mxu1 %vm708_vm0, %v6138_v36  ;;  %v5579_v36 = vld [vmem:[%s6996_s3 + $0xd8] sm:$0xff]  }
 0x1ee   : > { %5054 = vmatmul.mubr.msk.bf16.gmra.mrb[4].mxu1 %vm708_vm0, %v6151_v55  ;;  %v5580_v55 = vld [vmem:[%s6996_s3 + $0xe0] sm:$0xff]  }
 0x1ef   : > { %5057 = vmatprep.mubr.msk.bf16.mxu1 %vm708_vm0, %v6163_v15  ;;  %v2338_v15 = vld [vmem:[#allocation2 + $0x92] sm:$0xff] }
 0x1f6   : > { %5058 = vmatmul.mubr.msk.bf16.gmra.mrb[8].mxu1 %vm708_vm0, %v6175_v39  ;;  %v2339_v39 = vld [vmem:[#allocation2 + $0x9a] sm:$0xff] }
 0x1f7   : > { %5061 = vmatprep.mubr.msk.bf16.mxu1 %vm708_vm0, %v6187_v3  ;;  %v6419_v3 = vpack.c.bf16 %v2339_v39, %v2338_v15 }
 0x1fe   : > { %5062 = vmatmul.mubr.msk.bf16.gmra.mrb[12].mxu1 %vm708_vm0, %v6199_v21 }
 0x1ff   : > { %5065 = vmatprep.mubr.msk.bf16.mxu1 %vm708_vm0, %v6210_v48 }
 0x206   : > { %5066 = vmatmul.mubr.msk.bf16.gmra.mrb[16].mxu1 %vm708_vm0, %v6394_v38 }
 0x207   : > { %5077 = vmatprep.mubr.msk.bf16.mxu1 %vm708_vm0, %v1395_v28 }
 0x20e   : > { %5078 = vmatmul.mubr.msk.bf16.vlgmr.msra.gmra.mrb[20].mxu1 %vm708_vm0, %v6339_v59 }
 0x20f   : > { %5110 = vmatpush3.bf16.msra.mxu1 %v5576_v46  ;;  %5081 = vmatprep.mubr.msk.bf16.mxu1 %vm708_vm0, %v6352_v44  ;;  %v3009_v46 = vpack.c.bf16 %v2982_v32, %v2981_v54  ;;  %v2995_v32 = vld [vmem:[#allocation2 + $0x139] sm:$0xff]  ;;  %v2997_v54 = vld [vmem:[#allocation2 + $0x151] sm:$0xff] }
 0x210   : > { %5111 = vmatprep.subr.bf16.mxu1 %v5577_v61 }
 0x213   : > { %5112 = vmatpush3.bf16.msra.mxu1 %v5577_v61 }
 0x214   : > { %5113 = vmatprep.subr.bf16.mxu1 %v5578_v16 }
 0x216   : > { %5082 = vmatmul.mubr.msk.bf16.gmra.mrb[24].mxu1 %vm708_vm0, %v6354_v40 }
 0x217   : > { %5085 = vmatprep.mubr.msk.bf16.mxu1 %vm708_vm0, %v6370_v50  ;;  %5114 = vmatpush3.bf16.msra.mxu1 %v5578_v16  ;;  %v2986_v16 = vld [vmem:[#allocation2 + $0xc9] sm:$0xff] }
 0x218   : > { %5115 = vmatprep.subr.bf16.mxu1 %v5579_v36 }
 0x21b   : > { %5116 = vmatpush3.bf16.msra.mxu1 %v5579_v36 }
 0x21c   : > { %5149 = vmatprep.subr.bf16.mxu1 %v5580_v55 }
 0x21e   : > { %5086 = vmatmul.mubr.msk.bf16.gmra.mrb[28].mxu1 %vm708_vm0, %v6419_v3 }
 0x21f   : > { %5089 = vmatprep.mubr.msk.bf16.mxu1 %vm708_vm0, %v6101_v62  ;;  %v2358_v62 = vld [vmem:[#allocation2 + $0x182] sm:$0xff] }
 0x226   : > { %5090 = vmatmul.mubr.msk.bf16.gmra.mrb[0].mxu1 %vm708_vm0, %v6120_v17  ;;  %v2359_v17 = vld [vmem:[#allocation2 + $0x18a] sm:$0xff] }
 0x227   : > { %5093 = vmatprep.mubr.msk.bf16.mxu1 %vm708_vm0, %v6140_v37  ;;  %v6441_v37 = vpack.c.bf16 %v2359_v17, %v2358_v62  ;;  %v2985_v62 = vld [vmem:[#allocation2 + $0xc1] sm:$0xff] }
 0x228   : > { %v3011_v17 = vpack.c.bf16 %v2986_v16, %v2985_v62 }
 0x22e   : > { %5094 = vmatmul.mubr.msk.bf16.gmra.mrb[4].mxu1 %vm708_vm0, %v6153_v0  ;;  %v5581_v0 = vld [vmem:[%s6996_s3 + $0xe8] sm:$0xff]  }
 0x22f   : > { %5097 = vmatprep.mubr.msk.bf16.mxu1 %vm708_vm0, %v6165_v18  ;;  %v5582_v18 = vld [vmem:[%s6996_s3 + $0xf0] sm:$0xff]  }
 0x236   : > { %5098 = vmatmul.mubr.msk.bf16.gmra.mrb[8].mxu1 %vm708_vm0, %v6177_v41  ;;  %v5583_v41 = vld [vmem:[%s6996_s3 + $0xf8] sm:$0xff]  }
 0x237   : > { %5101 = vmatprep.mubr.msk.bf16.mxu1 %vm708_vm0, %v6189_v4  ;;  %v5584_v4 = vld [vmem:[%s6996_s3 + $0x100] sm:$0xff]  }
 0x23e   : > { %5102 = vmatmul.mubr.msk.bf16.gmra.mrb[12].mxu1 %vm708_vm0, %v6201_v23 }
 0x23f   : > { %5105 = vmatprep.mubr.msk.bf16.mxu1 %vm708_vm0, %v6212_v49 }
 0x246   : > { %5106 = vmatmul.mubr.msk.bf16.gmra.mrb[16].mxu1 %vm708_vm0, %v6441_v37 }
 0x247   : > { %5117 = vmatprep.mubr.msk.bf16.mxu1 %vm708_vm0, %v6221_v1  ;;  %v2681_v1 = vld [vmem:[#allocation2 + $0x198] sm:$0xff] }
 0x24e   : > { %5118 = vmatmul.mubr.msk.bf16.vlgmr.msra.gmra.mrb[20].mxu1 %vm708_vm0, %v6229_v6  ;;  %v2682_v6 = vld [vmem:[#allocation2 + $0x1a0] sm:$0xff] }
 0x24f   : > { %5150 = vmatpush3.bf16.msra.mxu1 %v5580_v55  ;;  %5121 = vmatprep.mubr.msk.bf16.mxu1 %vm708_vm0, %v6241_v26  ;;  %v2983_v55 = vld [vmem:[#allocation2 + $0xa9] sm:$0xff] }
 0x250   : > { %5151 = vmatprep.subr.bf16.mxu1 %v5581_v0  ;;  %v3010_v39 = vpack.c.bf16 %v2984_v22, %v2983_v55  ;;  %v2999_v22 = vld [vmem:[#allocation2 + $0x169] sm:$0xff]  ;;  %v3003_v55 = vld [vmem:[#allocation2 + $0x199] sm:$0xff] }
 0x253   : > { %5152 = vmatpush3.bf16.msra.mxu1 %v5581_v0 }
 0x254   : > { %5153 = vmatprep.subr.bf16.mxu1 %v5582_v18 }
 0x256   : > { %5122 = vmatmul.mubr.msk.bf16.gmra.mrb[24].mxu1 %vm708_vm0, %v6243_v13 }
 0x257   : > { %5125 = vmatprep.mubr.msk.bf16.mxu1 %vm708_vm0, %v6265_v20  ;;  %5154 = vmatpush3.bf16.msra.mxu1 %v5582_v18  ;;  %v2698_v20 = vpack.c.bf16 %v2682_v6, %v2681_v1  ;;  %v2988_v18 = vld [vmem:[#allocation2 + $0xe1] sm:$0xff]  ;;  %v2987_v6 = vld [vmem:[#allocation2 + $0xd9] sm:$0xff] }
 0x258   : > { %5155 = vmatprep.subr.bf16.mxu1 %v5583_v41 }
 0x25b   : > { %5156 = vmatpush3.bf16.msra.mxu1 %v5583_v41 }
 0x25c   : > { %5189 = vmatprep.subr.bf16.mxu1 %v5584_v4 }
 0x25e   : > { %5126 = vmatmul.mubr.msk.bf16.gmra.mrb[28].mxu1 %vm708_vm0, %v6267_v27  ;;  %v2974_v27 = vld [vmem:[#allocation2 + $0x39] sm:$0xff] }
 0x25f   : > { %5129 = vmatprep.mubr.msk.bf16.mxu1 %vm708_vm0, %v6279_v30 }
 0x266   : > { %5130 = vmatmul.mubr.msk.bf16.gmra.mrb[0].mxu1 %vm708_vm0, %v6281_v31 }
 0x267   : > { %5133 = vmatprep.mubr.msk.bf16.mxu1 %vm708_vm0, %v6291_v35  ;;  %v2973_v35 = vld [vmem:[#allocation2 + $0x31] sm:$0xff] }
 0x26e   : > { %5134 = vmatmul.mubr.msk.bf16.gmra.mrb[4].mxu1 %vm708_vm0, %v6293_v43  ;;  %v3005_v43 = vpack.c.bf16 %v2974_v27, %v2973_v35  ;;  %v3012_v27 = vpack.c.bf16 %v2988_v18, %v2987_v6  ;;  %v2989_v35 = vld [vmem:[#allocation2 + $0xf1] sm:$0xff]  ;;  %v3307_v18 = vld [vmem:[#allocation2 + $0xc2] sm:$0xff] }
 0x26f   : > { %5137 = vmatprep.mubr.msk.bf16.mxu1 %vm708_vm0, %v6303_v47  ;;  %v5588_v47 = vld [vmem:[%s6998_s5] ss:$8 sps:$4 sm:$0xff]  }
 0x276   : > { %5138 = vmatmul.mubr.msk.bf16.gmra.mrb[8].mxu1 %vm708_vm0, %v6305_v51  ;;  %v5590_v51 = vld [vmem:[%s6998_s5 + $0x4] ss:$8 sps:$4 sm:$0xff]  }
 0x277   : > { %5141 = vmatprep.mubr.msk.bf16.mxu1 %vm708_vm0, %v6315_v2  ;;  %3812 = vmatprep.subr.bf16.mxu0 %v5590_v51  ;;  %v5591_v2 = vld [vmem:[%s6998_s5 + $0x10] ss:$8 sps:$4 sm:$0xff]  }
 0x278   : > { %v6483_v21 = vpop.f32.mrb[76].mxu0  ;;  %3813 = vmatpush1.bf16.msra.mxu0 %v5588_v47  ;;  %v2992_v51 = vld [vmem:[#allocation2 + $0x111] sm:$0xff] }
 0x279   : > { %v6485_v23 = vpop.f32.mrb[77].mxu0  ;;  %3814 = vmatprep.subr.bf16.mxu0 %v5593_v63 }
 0x27a   : > { %v6487_v48 = vpop.f32.mrb[78].mxu0 }
 0x27b   : > { %v6489_v49 = vpop.f32.mrb[79].mxu0 }
 0x27c   : > { %3815 = vmatpush1.bf16.msra.mxu0 %v5591_v2 }
 0x27d   : > { %3816 = vmatprep.subr.bf16.mxu0 %v5596_v8 }
 0x27e   : > { %5142 = vmatmul.mubr.msk.bf16.gmra.mrb[12].mxu1 %vm708_vm0, %v6317_v7  ;;  %v2978_v7 = vld [vmem:[#allocation2 + $0x69] sm:$0xff] }
 0x27f   : > { %5145 = vmatprep.mubr.msk.bf16.mxu1 %vm708_vm0, %v6327_v56  ;;  %v2977_v56 = vld [vmem:[#allocation2 + $0x61] sm:$0xff] }
 0x280   : > { %v6495_v26 = vpop.f32.mrb[80].mxu0  ;;  %v3007_v19 = vpack.c.bf16 %v2978_v7, %v2977_v56  ;;  %3817 = vmatpush1.bf16.msra.mxu0 %v5594_v24  ;;  %v2991_v7 = vld [vmem:[#allocation2 + $0x109] sm:$0xff] }
 0x281   : > { %v6497_v13 = vpop.f32.mrb[81].mxu0  ;;  %v3014_v11 = vpack.c.bf16 %v2992_v51, %v2991_v7  ;;  %v3316_v7 = vld [vmem:[#allocation2 + $0x12a] sm:$0xff] }
 0x282   : > { %v6499_v30 = vpop.f32.mrb[82].mxu0 }
 0x283   : > { %v6501_v31 = vpop.f32.mrb[83].mxu0 }
 0x286   : > { %5146 = vmatmul.mubr.msk.bf16.gmra.mrb[16].mxu1 %vm708_vm0, %v2698_v20 }
 0x287   : > { %5157 = vmatprep.mubr.msk.bf16.mxu1 %vm708_vm0, %v3005_v43 }
 0x288   : > { %v6514_v52 = vpop.f32.mrb[84].mxu0 }
 0x289   : > { %v6519_v5 = vpop.f32.mrb[85].mxu0 }
 0x28a   : > { %v6524_v10 = vpop.f32.mrb[86].mxu0 }
 0x28b   : > { %v6526_v12 = vpop.f32.mrb[87].mxu0 }
 0x28e   : > { %5158 = vmatmul.mubr.msk.bf16.vlgmr.msra.gmra.mrb[20].mxu1 %vm708_vm0, %v3006_v14  ;;  %v2993_v14 = vld [vmem:[#allocation2 + $0x121] sm:$0xff] }
 0x28f   : > { %5190 = vmatpush3.bf16.msra.mxu1 %v5584_v4  ;;  %5161 = vmatprep.mubr.msk.bf16.mxu1 %vm708_vm0, %v3007_v19  ;;  %v2990_v4 = vld [vmem:[#allocation2 + $0xf9] sm:$0xff]  ;;  %v3015_v56 = vpack.c.bf16 %v2994_v53, %v2993_v14  ;;  %v2996_v19 = vld [vmem:[#allocation2 + $0x141] sm:$0xff] }
 0x290   : > { %5191 = vmatprep.subr.bf16.mxu1 %v5585_v60  ;;  %v6539_v28 = vpop.f32.mrb[88].mxu0  ;;  %v3013_v43 = vpack.c.bf16 %v2990_v4, %v2989_v35  ;;  %v3308_v4 = vld [vmem:[#allocation2 + $0xca] sm:$0xff]  ;;  %v3311_v35 = vld [vmem:[#allocation2 + $0xf2] sm:$0xff]  ;;  %v3315_v53 = vld [vmem:[#allocation2 + $0x122] sm:$0xff] }
 0x291   : > { %v6541_v25 = vpop.f32.mrb[89].mxu0  ;;  %v3337_v14 = vpack.c.bf16 %v3316_v7, %v3315_v53 }
 0x292   : > { %v6543_v33 = vpop.f32.mrb[90].mxu0 }
 0x293   : > { %5192 = vmatpush3.bf16.msra.mxu1 %v5585_v60  ;;  %v6545_v42 = vpop.f32.mrb[91].mxu0 }
 0x294   : > { %5193 = vmatprep.subr.bf16.mxu1 %v5586_v58 }
 0x296   : > { %5162 = vmatmul.mubr.msk.bf16.gmra.mrb[24].mxu1 %vm708_vm0, %v3008_v57  ;;  %v3016_v57 = vpack.c.bf16 %v2996_v19, %v2995_v32  ;;  %v3318_v19 = vld [vmem:[#allocation2 + $0x142] sm:$0xff]  ;;  %v3320_v32 = vld [vmem:[#allocation2 + $0x15a] sm:$0xff] }
 0x297   : > { %5165 = vmatprep.mubr.msk.bf16.mxu1 %vm708_vm0, %v3009_v46  ;;  %5194 = vmatpush3.bf16.msra.mxu1 %v5586_v58  ;;  %v2998_v58 = vld [vmem:[#allocation2 + $0x159] sm:$0xff]  ;;  %v3000_v46 = vld [vmem:[#allocation2 + $0x171] sm:$0xff] }
 0x298   : > { %5195 = vmatprep.subr.bf16.mxu1 %v5587_v45  ;;  %v6552_v9 = vpop.f32.mrb[92].mxu0  ;;  %v3018_v16 = vpack.c.bf16 %v3000_v46, %v2999_v22  ;;  %v3322_v46 = vld [vmem:[#allocation2 + $0x172] sm:$0xff] }
 0x299   : > { %v6554_v61 = vpop.f32.mrb[93].mxu0 }
 0x29a   : > { %v6556_v36 = vpop.f32.mrb[94].mxu0 }
 0x29b   : > { %5196 = vmatpush3.bf16.msra.mxu1 %v5587_v45  ;;  %v6558_v15 = vpop.f32.mrb[95].mxu0  ;;  %v3017_v45 = vpack.c.bf16 %v2998_v58, %v2997_v54  ;;  %v3319_v58 = vld [vmem:[#allocation2 + $0x152] sm:$0xff] }
 0x29c   : > { %v3339_v54 = vpack.c.bf16 %v3320_v32, %v3319_v58 }
 0x29e   : > { %5166 = vmatmul.mubr.msk.bf16.gmra.mrb[28].mxu1 %vm708_vm0, %v3010_v39  ;;  %v3004_v39 = vld [vmem:[#allocation2 + $0x1a1] sm:$0xff] }
 0x29f   : > { %5169 = vmatprep.mubr.msk.bf16.mxu1 %vm708_vm0, %v3011_v17  ;;  %v3020_v62 = vpack.c.bf16 %v3004_v39, %v3003_v55  ;;  %v3306_v17 = vld [vmem:[#allocation2 + $0xb2] sm:$0xff]  ;;  %v3326_v55 = vld [vmem:[#allocation2 + $0x1a2] sm:$0xff] }
 0x2a0   : > { %v6562_v0 = vpop.f32.mrb[64].mxu0 }
 0x2a1   : > { %v6564_v41 = vpop.f32.mrb[65].mxu0 }
 0x2a2   : > { %v6566_v1 = vpop.f32.mrb[66].mxu0 }
 0x2a3   : > { %v6568_v20 = vpop.f32.mrb[67].mxu0 }
 0x2a6   : > { %5170 = vmatmul.mubr.msk.bf16.gmra.mrb[0].mxu1 %vm708_vm0, %v3012_v27  ;;  %v3333_v27 = vpack.c.bf16 %v3308_v4, %v3307_v18 }
 0x2a7   : > { %5173 = vmatprep.mubr.msk.bf16.mxu1 %vm708_vm0, %v3013_v43 }
 0x2a8   : > { %v6572_v47 = vpop.f32.mrb[68].mxu0 }
 0x2a9   : > { %v6574_v63 = vpop.f32.mrb[69].mxu0 }
 0x2aa   : > { %v6576_v2 = vpop.f32.mrb[70].mxu0 }
 0x2ab   : > { %v6578_v8 = vpop.f32.mrb[71].mxu0 }
 0x2ae   : > { %5174 = vmatmul.mubr.msk.bf16.gmra.mrb[4].mxu1 %vm708_vm0, %v3014_v11 }
 0x2af   : > { %5177 = vmatprep.mubr.msk.bf16.mxu1 %vm708_vm0, %v3015_v56  ;;  %v3317_v56 = vld [vmem:[#allocation2 + $0x13a] sm:$0xff] }
 0x2b0   : > { %v6582_v60 = vpop.f32.mrb[72].mxu0 }
 0x2b1   : > { %v6584_v24 = vpop.f32.mrb[73].mxu0 }
 0x2b2   : > { %v6586_v29 = vpop.f32.mrb[74].mxu0 }
 0x2b3   : > { %v6588_v34 = vpop.f32.mrb[75].mxu0 }
 0x2b6   : > { %5178 = vmatmul.mubr.msk.bf16.gmra.mrb[8].mxu1 %vm708_vm0, %v3016_v57  ;;  %v3338_v57 = vpack.c.bf16 %v3318_v19, %v3317_v56 }
 0x2b7   : > { %5181 = vmatprep.mubr.msk.bf16.mxu1 %vm708_vm0, %v3017_v45  ;;  %v3321_v45 = vld [vmem:[#allocation2 + $0x16a] sm:$0xff] }
 0x2b8   : > { %v3340_v22 = vpack.c.bf16 %v3322_v46, %v3321_v45 }
 0x2be   : > { %5182 = vmatmul.mubr.msk.bf16.gmra.mrb[12].mxu1 %vm708_vm0, %v3018_v16  ;;  %v3325_v16 = vld [vmem:[#allocation2 + $0x19a] sm:$0xff] }
 0x2bf   : > { %5185 = vmatprep.mubr.msk.bf16.mxu1 %vm708_vm0, %v6394_v38  ;;  %v3305_v38 = vld [vmem:[#allocation2 + $0xaa] sm:$0xff]  ;;  %v3342_v39 = vpack.c.bf16 %v3326_v55, %v3325_v16 }
 0x2c0   : > { %v3332_v6 = vpack.c.bf16 %v3306_v17, %v3305_v38  ;;  %v5597_v38 = vld [vmem:[%s6998_s5 + $0x30] ss:$8 sps:$4 sm:$0xff]   ;;  %v5729_v17 = vmov 0  }
 0x2c1   : > { %3844 = vmatprep.mubr.bf16.mxu0 %v5729_v17 }
 0x2c6   : > { %5186 = vmatmul.mubr.msk.bf16.gmra.mrb[16].mxu1 %vm708_vm0, %v3020_v62  ;;  %v5599_v62 = vld [vmem:[%s6998_s5 + $0x34] ss:$8 sps:$4 sm:$0xff]  }
 0x2c7   : > { %5197 = vmatprep.mubr.msk.bf16.mxu1 %vm708_vm0, %v6339_v59  ;;  %v3309_v59 = vld [vmem:[#allocation2 + $0xda] sm:$0xff]  ;;  %3818 = vmatprep.subr.bf16.mxu0 %v5599_v62 }
 0x2c8   : > { %3819 = vmatpush1.bf16.msra.mxu0 %v5597_v38 }
 0x2ce   : > { %5198 = vmatmul.mubr.msk.bf16.vlgmr.msra.gmra.mrb[20].mxu1 %vm708_vm0, %v6352_v44  ;;  %v3310_v44 = vld [vmem:[#allocation2 + $0xe2] sm:$0xff] }
 0x2cf   : > { %5201 = vmatprep.mubr.msk.bf16.mxu1 %vm708_vm0, %v6354_v40  ;;  %v3312_v40 = vld [vmem:[#allocation2 + $0xfa] sm:$0xff]  ;;  %v3334_v43 = vpack.c.bf16 %v3310_v44, %v3309_v59 }
 0x2d0   : > { %v3335_v51 = vpack.c.bf16 %v3312_v40, %v3311_v35 }
 0x2d6   : > { %5202 = vmatmul.mubr.msk.bf16.gmra.mrb[24].mxu1 %vm708_vm0, %v6370_v50  ;;  %v3313_v50 = vld [vmem:[#allocation2 + $0x10a] sm:$0xff] }
 0x2d7   : > { %5205 = vmatprep.mubr.msk.bf16.mxu1 %vm708_vm0, %v6419_v3  ;;  %v3314_v3 = vld [vmem:[#allocation2 + $0x112] sm:$0xff] }
 0x2d8   : > { %v3336_v11 = vpack.c.bf16 %v3314_v3, %v3313_v50 }
 0x2de   : > { %5206 = vmatmul.mubr.msk.bf16.gmra.mrb[28].mxu1 %vm708_vm0, %v3332_v6 }
 0x2df   : > { %5209 = vmatprep.mubr.msk.bf16.mxu1 %vm708_vm0, %v3333_v27 }
 0x2e6   : > { %5210 = vmatmul.mubr.msk.bf16.gmra.mrb[0].mxu1 %vm708_vm0, %v3334_v43 }
 0x2e7   : > { %5213 = vmatprep.mubr.msk.bf16.mxu1 %vm708_vm0, %v3335_v51 }
 0x2ee   : > { %5214 = vmatmul.mubr.msk.bf16.gmra.mrb[4].mxu1 %vm708_vm0, %v3336_v11 }
 0x2ef   : > { %5217 = vmatprep.mubr.msk.bf16.mxu1 %vm708_vm0, %v3337_v14 }
 0x2f6   : > { %5218 = vmatmul.mubr.msk.bf16.gmra.mrb[8].mxu1 %vm708_vm0, %v3338_v57 }
 0x2f7   : > { %5221 = vmatprep.mubr.msk.bf16.mxu1 %vm708_vm0, %v3339_v54 }
 0x2fe   : > { %5222 = vmatmul.mubr.msk.bf16.gmra.mrb[12].mxu1 %vm708_vm0, %v3340_v22 }
 0x2ff   : > { %5225 = vmatprep.mubr.msk.bf16.mxu1 %vm708_vm0, %v6441_v37  ;;  %v6628_v37 = vld [vmem:[%s6997_s4] ss:$0 sm:$0xff] }
 0x306   : > { %5226 = vmatmul.mubr.msk.bf16.gmra.mrb[16].mxu1 %vm708_vm0, %v3342_v39 }
 0x3a1   : > { %v5199_v18 = vpop.f32.mrb[20].mxu1 }
 0x3a2   : > { %v5237_v4 = vadd.f32 %v5199_v18, %v6562_v0  ;;  %v3458_v6 = vpop.f32.mrb[21].mxu1 }
 0x3a3   : > { %v5238_v27 = vadd.f32 %v3458_v6, %v6564_v41  ;;  %v5200_v59 = vpop.f32.mrb[22].mxu1 }
 0x3a4   : > { %v3626_v44 = vadd.f32 %v5237_v4, %v6628_v37  ;;  %v5239_v35 = vadd.f32 %v5200_v59, %v6566_v1  ;;  %v3461_v40 = vpop.f32.mrb[23].mxu1 }
 0x3a5   : > { %v3624_v43 = vadd.f32 %v5238_v27, %v6628_v37  ;;  %v5240_v51 = vadd.f32 %v3461_v40, %v6568_v20 }
 0x3a6   : > { %v3627_v50 = vadd.f32 %v5239_v35, %v6628_v37  ;;  %v3658_v53 = vmax.f32 %v3626_v44, 0.0 }
 0x3a7   : > { %v3625_v3 = vadd.f32 %v5240_v51, %v6628_v37  ;;  %v3656_v0 = vmax.f32 %v3624_v43, 0.0 }
 0x3a8   : > { %v3659_v7 = vmax.f32 %v3627_v50, 0.0 }
 0x3a9   : > { %v3657_v11 = vmax.f32 %v3625_v3, 0.0  ;;  %v5203_v14 = vpop.f32.mrb[24].mxu1 }
 0x3aa   : > { %v3689_v41 = vpack.c.bf16 %v3659_v7, %v3658_v53  ;;  %v5241_v56 = vadd.f32 %v5203_v14, %v6572_v47  ;;  %v3474_v19 = vpop.f32.mrb[25].mxu1 }
 0x3ab   : > { %v3688_v58 = vpack.c.bf16 %v3657_v11, %v3656_v0  ;;  %v5242_v1 = vadd.f32 %v3474_v19, %v6574_v63  ;;  %v5204_v32 = vpop.f32.mrb[26].mxu1 }
 0x3ac   : > { %v3630_v57 = vadd.f32 %v5241_v56, %v6628_v37  ;;  %v5243_v20 = vadd.f32 %v5204_v32, %v6576_v2  ;;  %v3477_v54 = vpop.f32.mrb[27].mxu1 }
 0x3ad   : > { %v3628_v45 = vadd.f32 %v5242_v1, %v6628_v37  ;;  %v5244_v46 = vadd.f32 %v3477_v54, %v6578_v8  ;;  %4552 = vmatmul.mubr.msk.bf16.vlgmr.msra.gmra.mrb[96].mxu0 %vm708_vm0, %v3688_v58 }
 0x3ae   : > { %v3631_v22 = vadd.f32 %v5243_v20, %v6628_v37  ;;  %3854 = vmatprep.mubr.bf16.mxu0 %v5729_v17  ;;  %v3662_v16 = vmax.f32 %v3630_v57, 0.0 }
 0x3af   : > { %v3629_v47 = vadd.f32 %v5244_v46, %v6628_v37  ;;  %v3660_v55 = vmax.f32 %v3628_v45, 0.0 }
 0x3b0   : > { %v3663_v63 = vmax.f32 %v3631_v22, 0.0 }
 0x3b1   : > { %v3661_v39 = vmax.f32 %v3629_v47, 0.0  ;;  %v5207_v62 = vpop.f32.mrb[28].mxu1 }
 0x3b2   : > { %v3691_v38 = vpack.c.bf16 %v3663_v63, %v3662_v16  ;;  %v5245_v2 = vadd.f32 %v5207_v62, %v6582_v60  ;;  %v3490_v18 = vpop.f32.mrb[29].mxu1 }
 0x3b3   : > { %v3690_v4 = vpack.c.bf16 %v3661_v39, %v3660_v55  ;;  %v5246_v8 = vadd.f32 %v3490_v18, %v6584_v24  ;;  %v5208_v6 = vpop.f32.mrb[30].mxu1 }
 0x3b4   : > { %v3634_v27 = vadd.f32 %v5245_v2, %v6628_v37  ;;  %v5247_v59 = vadd.f32 %v5208_v6, %v6586_v29  ;;  %v3493_v44 = vpop.f32.mrb[31].mxu1 }
 0x3b5   : > { %v3632_v35 = vadd.f32 %v5246_v8, %v6628_v37  ;;  %v5248_v40 = vadd.f32 %v3493_v44, %v6588_v34  ;;  %4553 = vmatmul.mubr.msk.bf16.gmra.mrb[100].mxu0 %vm708_vm0, %v3689_v41 }
 0x3b6   : > { %v3635_v43 = vadd.f32 %v5247_v59, %v6628_v37  ;;  %3864 = vmatprep.mubr.bf16.mxu0 %v5729_v17  ;;  %v3666_v51 = vmax.f32 %v3634_v27, 0.0 }
 0x3b7   : > { %v3633_v60 = vadd.f32 %v5248_v40, %v6628_v37  ;;  %v3664_v50 = vmax.f32 %v3632_v35, 0.0 }
 0x3b8   : > { %v3667_v24 = vmax.f32 %v3635_v43, 0.0 }
 0x3b9   : > { %v3665_v3 = vmax.f32 %v3633_v60, 0.0  ;;  %v5211_v53 = vpop.f32.mrb[0].mxu1 }
 0x3ba   : > { %v6658_v7 = vpack.c.bf16 %v3667_v24, %v3666_v51  ;;  %v5249_v29 = vadd.f32 %v5211_v53, %v6483_v21  ;;  %v3506_v0 = vpop.f32.mrb[1].mxu1 }
 0x3bb   : > { %v3692_v11 = vpack.c.bf16 %v3665_v3, %v3664_v50  ;;  %v5250_v34 = vadd.f32 %v3506_v0, %v6485_v23  ;;  %v5212_v14 = vpop.f32.mrb[2].mxu1 }
 0x3bc   : > { %v3638_v41 = vadd.f32 %v5249_v29, %v6628_v37  ;;  %v5251_v56 = vadd.f32 %v5212_v14, %v6487_v48  ;;  %v3509_v19 = vpop.f32.mrb[3].mxu1 }
 0x3bd   : > { %v3636_v58 = vadd.f32 %v5250_v34, %v6628_v37  ;;  %v5252_v1 = vadd.f32 %v3509_v19, %v6489_v49  ;;  %4554 = vmatmul.mubr.msk.bf16.gmra.mrb[104].mxu0 %vm708_vm0, %v3690_v4 }
 0x3be   : > { %v3639_v32 = vadd.f32 %v5251_v56, %v6628_v37  ;;  %3874 = vmatprep.mubr.bf16.mxu0 %v5729_v17  ;;  %v3670_v57 = vmax.f32 %v3638_v41, 0.0 }
 0x3bf   : > { %v3637_v21 = vadd.f32 %v5252_v1, %v6628_v37  ;;  %v3668_v20 = vmax.f32 %v3636_v58, 0.0 }
 0x3c0   : > { %v3671_v23 = vmax.f32 %v3639_v32, 0.0 }
 0x3c1   : > { %v3669_v54 = vmax.f32 %v3637_v21, 0.0  ;;  %v5215_v45 = vpop.f32.mrb[4].mxu1 }
 0x3c2   : > { %v6670_v46 = vpack.c.bf16 %v3671_v23, %v3670_v57  ;;  %v5253_v48 = vadd.f32 %v5215_v45, %v6495_v26  ;;  %v3522_v22 = vpop.f32.mrb[5].mxu1 }
 0x3c3   : > { %v6673_v47 = vpack.c.bf16 %v3669_v54, %v3668_v20  ;;  %v5254_v49 = vadd.f32 %v3522_v22, %v6497_v13  ;;  %v5216_v16 = vpop.f32.mrb[6].mxu1 }
 0x3c4   : > { %v3642_v63 = vadd.f32 %v5253_v48, %v6628_v37  ;;  %v5255_v55 = vadd.f32 %v5216_v16, %v6499_v30  ;;  %v3525_v39 = vpop.f32.mrb[7].mxu1 }
 0x3c5   : > { %v3640_v62 = vadd.f32 %v5254_v49, %v6628_v37  ;;  %v5256_v2 = vadd.f32 %v3525_v39, %v6501_v31  ;;  %4555 = vmatmul.mubr.msk.bf16.gmra.mrb[108].mxu0 %vm708_vm0, %v3691_v38 }
 0x3c6   : > { %v3643_v18 = vadd.f32 %v5255_v55, %v6628_v37  ;;  %3884 = vmatprep.mubr.bf16.mxu0 %v5729_v17  ;;  %v3674_v4 = vmax.f32 %v3642_v63, 0.0 }
 0x3c7   : > { %v3641_v26 = vadd.f32 %v5256_v2, %v6628_v37  ;;  %v3672_v8 = vmax.f32 %v3640_v62, 0.0 }
 0x3c8   : > { %v3675_v13 = vmax.f32 %v3643_v18, 0.0 }
 0x3c9   : > { %v3673_v6 = vmax.f32 %v3641_v26, 0.0  ;;  %v5219_v27 = vpop.f32.mrb[8].mxu1 }
 0x3ca   : > { %v6684_v59 = vpack.c.bf16 %v3675_v13, %v3674_v4  ;;  %v5257_v30 = vadd.f32 %v5219_v27, %v6514_v52  ;;  %v3538_v44 = vpop.f32.mrb[9].mxu1 }
 0x3cb   : > { %v3696_v35 = vpack.c.bf16 %v3673_v6, %v3672_v8  ;;  %v5258_v31 = vadd.f32 %v3538_v44, %v6519_v5  ;;  %v5220_v38 = vpop.f32.mrb[10].mxu1 }
 0x3cc   : > { %v3646_v40 = vadd.f32 %v5257_v30, %v6628_v37  ;;  %v5259_v43 = vadd.f32 %v5220_v38, %v6524_v10  ;;  %v3541_v60 = vpop.f32.mrb[11].mxu1 }
 0x3cd   : > { %v3644_v51 = vadd.f32 %v5258_v31, %v6628_v37  ;;  %v5260_v24 = vadd.f32 %v3541_v60, %v6526_v12  ;;  %4556 = vmatmul.mubr.msk.bf16.gmra.mrb[112].mxu0 %vm708_vm0, %v3692_v11 }
 0x3ce   : > { %v3647_v50 = vadd.f32 %v5259_v43, %v6628_v37  ;;  %3894 = vmatprep.mubr.bf16.mxu0 %v5729_v17  ;;  %v3678_v3 = vmax.f32 %v3646_v40, 0.0  ;;  %v5601_v43 = vld [vmem:[%s5852_s22 + $0x8] sm:$0xff] }
 0x3cf   : > { %v3645_v52 = vadd.f32 %v5260_v24, %v6628_v37  ;;  %v3676_v53 = vmax.f32 %v3644_v51, 0.0 }
 0x3d0   : > { %v3679_v5 = vmax.f32 %v3647_v50, 0.0  ;;  %v5602_v50 = vld [vmem:[%s5852_s22 + $0x10] sm:$0xff] }
 0x3d1   : > { %v3677_v29 = vmax.f32 %v3645_v52, 0.0  ;;  %v5223_v0 = vpop.f32.mrb[12].mxu1 }
 0x3d2   : > { %v3699_v34 = vpack.c.bf16 %v3679_v5, %v3678_v3  ;;  %v5261_v10 = vadd.f32 %v5223_v0, %v6539_v28  ;;  %v3554_v14 = vpop.f32.mrb[13].mxu1  ;;  %v5603_v5 = vld [vmem:[%s5852_s22 + $0x18] sm:$0xff] }
 0x3d3   : > { %v3698_v41 = vpack.c.bf16 %v3677_v29, %v3676_v53  ;;  %v5262_v12 = vadd.f32 %v3554_v14, %v6541_v25  ;;  %v5224_v56 = vpop.f32.mrb[14].mxu1 }
 0x3d4   : > { %v3650_v11 = vadd.f32 %v5261_v10, %v6628_v37  ;;  %v5263_v19 = vadd.f32 %v5224_v56, %v6543_v33  ;;  %v3557_v58 = vpop.f32.mrb[15].mxu1  ;;  %v5604_v56 = vld [vmem:[%s5852_s22 + $0x20] sm:$0xff] }
 0x3d5   : > { %v3648_v1 = vadd.f32 %v5262_v12, %v6628_v37  ;;  %v5264_v32 = vadd.f32 %v3557_v58, %v6545_v42  ;;  %4557 = vmatmul.mubr.msk.bf16.gmra.mrb[116].mxu0 %vm708_vm0, %v6658_v7 }
 0x3d6   : > { %v3651_v21 = vadd.f32 %v5263_v19, %v6628_v37  ;;  %3904 = vmatprep.mubr.bf16.mxu0 %v5729_v17  ;;  %v3682_v25 = vmax.f32 %v3650_v11, 0.0 }
 0x3d7   : > { %v3649_v28 = vadd.f32 %v5264_v32, %v6628_v37  ;;  %v3680_v23 = vmax.f32 %v3648_v1, 0.0  ;;  %v5605_v1 = vld [vmem:[%s5852_s22 + $0x28] sm:$0xff] }
 0x3d8   : > { %v3683_v57 = vmax.f32 %v3651_v21, 0.0 }
 0x3d9   : > { %v3681_v20 = vmax.f32 %v3649_v28, 0.0  ;;  %v5227_v54 = vpop.f32.mrb[16].mxu1 }
 0x3da   : > { %v3701_v33 = vpack.c.bf16 %v3683_v57, %v3682_v25  ;;  %v5265_v45 = vadd.f32 %v5227_v54, %v6552_v9  ;;  %v3570_v48 = vpop.f32.mrb[17].mxu1  ;;  %v5606_v25 = vld [vmem:[%s5852_s22 + $0x30] sm:$0xff] }
 0x3db   : > { %v3700_v22 = vpack.c.bf16 %v3681_v20, %v3680_v23  ;;  %v5266_v42 = vadd.f32 %v3570_v48, %v6554_v61  ;;  %v5228_v49 = vpop.f32.mrb[18].mxu1  ;;  %v5607_v20 = vld [vmem:[%s5852_s22 + $0x38] sm:$0xff] }
 0x3dc   : > { %v3654_v7 = vadd.f32 %v5265_v45, %v6628_v37  ;;  %v5267_v16 = vadd.f32 %v5228_v49, %v6556_v36  ;;  %v3573_v63 = vpop.f32.mrb[19].mxu1 }
 0x3dd   : > { %v3652_v55 = vadd.f32 %v5266_v42, %v6628_v37  ;;  %v5268_v39 = vadd.f32 %v3573_v63, %v6558_v15  ;;  %4558 = vmatmul.mubr.msk.bf16.gmra.mrb[120].mxu0 %vm708_vm0, %v6673_v47  ;;  %v3714_v15 = vlaneseq  ;;  %v3712_v47 = vld [vmem:[%s6999_s6] sm:$0x3] }
 0x3de   : > { %v3655_v62 = vadd.f32 %v5267_v16, %v6628_v37  ;;  %3914 = vmatprep.mubr.bf16.mxu0 %v5729_v17  ;;  %v3686_v61 = vmax.f32 %v3654_v7, 0.0  ;;  %v5608_v16 = vld [vmem:[%s5852_s22 + $0x40] sm:$0xff] }
 0x3df   : > { %v3653_v9 = vadd.f32 %v5268_v39, %v6628_v37  ;;  %v3684_v18 = vmax.f32 %v3652_v55, 0.0  ;;  %v3715_v37 = vshrl.u32 %v3714_v15, 7 }
 0x3e0   : > { %v3687_v2 = vmax.f32 %v3655_v62, 0.0  ;;  %v5609_v62 = vld [vmem:[%s5852_s22 + $0x48] sm:$0xff] }
 0x3e1   : > { %v3685_v26 = vmax.f32 %v3653_v9, 0.0  ;;  %v3720_v13 = vsub.s32 1, %v3715_v37 }
 0x3e2   : > { %v3703_v4 = vpack.c.bf16 %v3687_v2, %v3686_v61 }
 0x3e3   : > { %v3702_v36 = vpack.c.bf16 %v3685_v26, %v3684_v18  ;;  %v6743_v6 = vrot.slane %v3712_v47, %v3720_v13  ;;  %v5610_v18 = vld [vmem:[%s5852_s22 + $0x50] sm:$0xff] }
 0x3e5   : > { %4559 = vmatmul.mubr.msk.bf16.gmra.mrb[124].mxu0 %vm708_vm0, %v6670_v46  ;;  %v3716_v46 = vsub.s32 0, %v3715_v37 }
 0x3e6   : > { %3924 = vmatprep.mubr.bf16.mxu0 %v5729_v17 }
 0x3e7   : > { %v6740_v8 = vrot.slane %v3712_v47, %v3716_v46 }
 0x3ed   : > { %4560 = vmatmul.mubr.msk.bf16.gmra.mrb[128].mxu0 %vm708_vm0, %v3696_v35  ;;  %v5600_v35 = vld [vmem:[%s5852_s22] sm:$0xff] }
 0x3ee   : > { %3934 = vmatprep.mubr.bf16.mxu0 %v5729_v17 }
 0x3f5   : > { %4561 = vmatmul.mubr.msk.bf16.gmra.mrb[132].mxu0 %vm708_vm0, %v6684_v59 }
 0x3f6   : > { %3944 = vmatprep.mubr.bf16.mxu0 %v5729_v17 }
 0x3fd   : > { %4562 = vmatmul.mubr.msk.bf16.gmra.mrb[136].mxu0 %vm708_vm0, %v3698_v41 }
 0x3fe   : > { %3954 = vmatprep.mubr.bf16.mxu0 %v5729_v17 }
 0x405   : > { %4563 = vmatmul.mubr.msk.bf16.gmra.mrb[140].mxu0 %vm708_vm0, %v3699_v34 }
 0x406   : > { %3964 = vmatprep.mubr.bf16.mxu0 %v5729_v17 }
 0x40d   : > { %4564 = vmatmul.mubr.msk.bf16.gmra.mrb[144].mxu0 %vm708_vm0, %v3700_v22 }
 0x40e   : > { %3974 = vmatprep.mubr.bf16.mxu0 %v5729_v17 }
 0x415   : > { %4565 = vmatmul.mubr.msk.bf16.gmra.mrb[148].mxu0 %vm708_vm0, %v3701_v33 }
 0x416   : > { %3984 = vmatprep.mubr.bf16.mxu0 %v5729_v17 }
 0x41d   : > { %4566 = vmatmul.mubr.msk.bf16.gmra.mrb[152].mxu0 %vm708_vm0, %v3702_v36  ;;  %v5611_v36 = vld [vmem:[%s5852_s22 + $0x58] sm:$0xff] }
 0x41e   : > { %3994 = vmatprep.mubr.bf16.mxu0 %v5729_v17 }
 0x425   : > { %4567 = vmatmul.mubr.msk.bf16.gmra.mrb[156].mxu0 %vm708_vm0, %v3703_v4 }
 0x480   : > { %v3846_v27 = vpop.f32.mrb[96].mxu0 }
 0x481   : > { %v3847_v17 = vadd.f32 %v3846_v27, %v6740_v8  ;;  %v3848_v59 = vpop.f32.mrb[97].mxu0 }
 0x482   : > { %v3849_v30 = vadd.f32 %v3848_v59, %v6743_v6  ;;  %v3850_v44 = vpop.f32.mrb[98].mxu0 }
 0x483   : > { %v4005_v31 = vadd.f32 %v5600_v35, %v3847_v17  ;;  %v3851_v38 = vadd.f32 %v3850_v44, %v6740_v8  ;;  %v3852_v40 = vpop.f32.mrb[99].mxu0 }
 0x484   : > { %v4006_v60 = vadd.f32 %v5601_v43, %v3849_v30  ;;  %v3853_v51 = vadd.f32 %v3852_v40, %v6743_v6  ;;  %v5612_v30 = vld [vmem:[%s5852_s22 + $0x60] sm:$0xff] }
 0x485   : > { %v4069_v24 = vmax.f32 %v4005_v31, 0.0  ;;  %v4007_v52 = vadd.f32 %v5602_v50, %v3851_v38  ;;  %v5613_v38 = vld [vmem:[%s5852_s22 + $0x68] sm:$0xff] }
 0x486   : > { %v4070_v3 = vmax.f32 %v4006_v60, 0.0  ;;  %v4008_v53 = vadd.f32 %v5603_v5, %v3853_v51  ;;  %v5614_v51 = vld [vmem:[%s5852_s22 + $0x70] sm:$0xff] }
 0x487   : > { %4133 = vst [vmem:[%s6755_s14] sm:$0xff] %v4069_v24  ;;  %v4071_v29 = vmax.f32 %v4007_v52, 0.0  ;;  %v5615_v52 = vld [vmem:[%s5852_s22 + $0x78] sm:$0xff] }
 0x488   : > { %4134 = vst [vmem:[%s6755_s14 + $0x8] sm:$0xff] %v4070_v3  ;;  %v4072_v0 = vmax.f32 %v4008_v53, 0.0  ;;  %v3856_v34 = vpop.f32.mrb[100].mxu0 }
 0x489   : > { %4135 = vst [vmem:[%s6755_s14 + $0x10] sm:$0xff] %v4071_v29  ;;  %v3857_v10 = vadd.f32 %v3856_v34, %v6740_v8  ;;  %v3858_v14 = vpop.f32.mrb[101].mxu0 }
 0x48a   : > { %4136 = vst [vmem:[%s6755_s14 + $0x18] sm:$0xff] %v4072_v0  ;;  %v3859_v41 = vadd.f32 %v3858_v14, %v6743_v6  ;;  %v3860_v12 = vpop.f32.mrb[102].mxu0 }
 0x48b   : > { %v4009_v11 = vadd.f32 %v5604_v56, %v3857_v10  ;;  %v3861_v19 = vadd.f32 %v3860_v12, %v6740_v8  ;;  %v3862_v58 = vpop.f32.mrb[103].mxu0 }
 0x48c   : > { %v4010_v32 = vadd.f32 %v5605_v1, %v3859_v41  ;;  %v3863_v21 = vadd.f32 %v3862_v58, %v6743_v6  ;;  %v5616_v41 = vld [vmem:[%s5852_s22 + $0x80] sm:$0xff] }
 0x48d   : > { %v4073_v28 = vmax.f32 %v4009_v11, 0.0  ;;  %v4011_v57 = vadd.f32 %v5606_v25, %v3861_v19  ;;  %v5617_v19 = vld [vmem:[%s5852_s22 + $0x88] sm:$0xff] }
 0x48e   : > { %v4074_v23 = vmax.f32 %v4010_v32, 0.0  ;;  %v4012_v54 = vadd.f32 %v5607_v20, %v3863_v21  ;;  %v5618_v21 = vld [vmem:[%s5852_s22 + $0x90] sm:$0xff] }
 0x48f   : > { %4137 = vst [vmem:[%s6755_s14 + $0x20] sm:$0xff] %v4073_v28  ;;  %v4075_v33 = vmax.f32 %v4011_v57, 0.0  ;;  %v5619_v57 = vld [vmem:[%s5852_s22 + $0x98] sm:$0xff] }
 0x490   : > { %4138 = vst [vmem:[%s6755_s14 + $0x28] sm:$0xff] %v4074_v23  ;;  %v4076_v45 = vmax.f32 %v4012_v54, 0.0  ;;  %v3866_v48 = vpop.f32.mrb[104].mxu0 }
 0x491   : > { %4139 = vst [vmem:[%s6755_s14 + $0x30] sm:$0xff] %v4075_v33  ;;  %v3867_v22 = vadd.f32 %v3866_v48, %v6740_v8  ;;  %v3868_v42 = vpop.f32.mrb[105].mxu0 }
 0x492   : > { %4140 = vst [vmem:[%s6755_s14 + $0x38] sm:$0xff] %v4076_v45  ;;  %v3869_v49 = vadd.f32 %v3868_v42, %v6743_v6  ;;  %v3870_v7 = vpop.f32.mrb[106].mxu0 }
 0x493   : > { %v4013_v63 = vadd.f32 %v5608_v16, %v3867_v22  ;;  %v3871_v55 = vadd.f32 %v3870_v7, %v6740_v8  ;;  %v3872_v39 = vpop.f32.mrb[107].mxu0 }
 0x494   : > { %v4014_v9 = vadd.f32 %v5609_v62, %v3869_v49  ;;  %v3873_v61 = vadd.f32 %v3872_v39, %v6743_v6  ;;  %v5620_v49 = vld [vmem:[%s5852_s22 + $0xa0] sm:$0xff] }
 0x495   : > { %v4077_v2 = vmax.f32 %v4013_v63, 0.0  ;;  %v4015_v26 = vadd.f32 %v5610_v18, %v3871_v55  ;;  %v5621_v55 = vld [vmem:[%s5852_s22 + $0xa8] sm:$0xff] }
 0x496   : > { %v4078_v4 = vmax.f32 %v4014_v9, 0.0  ;;  %v4016_v15 = vadd.f32 %v5611_v36, %v3873_v61  ;;  %v5622_v61 = vld [vmem:[%s5852_s22 + $0xb0] sm:$0xff] }
 0x497   : > { %4141 = vst [vmem:[%s6755_s14 + $0x40] sm:$0xff] %v4077_v2  ;;  %v4079_v37 = vmax.f32 %v4015_v26, 0.0  ;;  %v5623_v26 = vld [vmem:[%s5852_s22 + $0xb8] sm:$0xff] }
 0x498   : > { %4142 = vst [vmem:[%s6755_s14 + $0x48] sm:$0xff] %v4078_v4  ;;  %v4080_v46 = vmax.f32 %v4016_v15, 0.0  ;;  %v3876_v47 = vpop.f32.mrb[108].mxu0 }
 0x499   : > { %4143 = vst [vmem:[%s6755_s14 + $0x50] sm:$0xff] %v4079_v37  ;;  %v3877_v13 = vadd.f32 %v3876_v47, %v6740_v8  ;;  %v3878_v27 = vpop.f32.mrb[109].mxu0 }
 0x49a   : > { %4144 = vst [vmem:[%s6755_s14 + $0x58] sm:$0xff] %v4080_v46  ;;  %v3879_v17 = vadd.f32 %v3878_v27, %v6743_v6  ;;  %v3880_v59 = vpop.f32.mrb[110].mxu0 }
 0x49b   : > { %v4017_v44 = vadd.f32 %v5612_v30, %v3877_v13  ;;  %v3881_v35 = vadd.f32 %v3880_v59, %v6740_v8  ;;  %v3882_v31 = vpop.f32.mrb[111].mxu0 }
 0x49c   : > { %v4018_v40 = vadd.f32 %v5613_v38, %v3879_v17  ;;  %v3883_v43 = vadd.f32 %v3882_v31, %v6743_v6  ;;  %v5624_v17 = vld [vmem:[%s5852_s22 + $0xc0] sm:$0xff] }
 0x49d   : > { %v4081_v60 = vmax.f32 %v4017_v44, 0.0  ;;  %v4019_v24 = vadd.f32 %v5614_v51, %v3881_v35  ;;  %v5625_v35 = vld [vmem:[%s5852_s22 + $0xc8] sm:$0xff] }
 0x49e   : > { %v4082_v50 = vmax.f32 %v4018_v40, 0.0  ;;  %v4020_v3 = vadd.f32 %v5615_v52, %v3883_v43  ;;  %v5626_v43 = vld [vmem:[%s5852_s22 + $0xd0] sm:$0xff] }
 0x49f   : > { %4145 = vst [vmem:[%s6755_s14 + $0x60] sm:$0xff] %v4081_v60  ;;  %v4083_v5 = vmax.f32 %v4019_v24, 0.0  ;;  %v5627_v24 = vld [vmem:[%s5852_s22 + $0xd8] sm:$0xff] }
 0x4a0   : > { %4146 = vst [vmem:[%s6755_s14 + $0x68] sm:$0xff] %v4082_v50  ;;  %v4084_v53 = vmax.f32 %v4020_v3, 0.0  ;;  %v3886_v29 = vpop.f32.mrb[112].mxu0 }
 0x4a1   : > { %4147 = vst [vmem:[%s6755_s14 + $0x70] sm:$0xff] %v4083_v5  ;;  %v3887_v0 = vadd.f32 %v3886_v29, %v6740_v8  ;;  %v3888_v34 = vpop.f32.mrb[113].mxu0 }
 0x4a2   : > { %4148 = vst [vmem:[%s6755_s14 + $0x78] sm:$0xff] %v4084_v53  ;;  %v3889_v10 = vadd.f32 %v3888_v34, %v6743_v6  ;;  %v3890_v14 = vpop.f32.mrb[114].mxu0 }
 0x4a3   : > { %v4021_v12 = vadd.f32 %v5616_v41, %v3887_v0  ;;  %v3891_v56 = vadd.f32 %v3890_v14, %v6740_v8  ;;  %v3892_v11 = vpop.f32.mrb[115].mxu0 }
 0x4a4   : > { %v4022_v58 = vadd.f32 %v5617_v19, %v3889_v10  ;;  %v3893_v1 = vadd.f32 %v3892_v11, %v6743_v6  ;;  %v5628_v10 = vld [vmem:[%s5852_s22 + $0xe0] sm:$0xff] }
 0x4a5   : > { %v4085_v32 = vmax.f32 %v4021_v12, 0.0  ;;  %v4023_v28 = vadd.f32 %v5618_v21, %v3891_v56  ;;  %v5629_v56 = vld [vmem:[%s5852_s22 + $0xe8] sm:$0xff] }
 0x4a6   : > { %v4086_v25 = vmax.f32 %v4022_v58, 0.0  ;;  %v4024_v23 = vadd.f32 %v5619_v57, %v3893_v1  ;;  %v5630_v1 = vld [vmem:[%s5852_s22 + $0xf0] sm:$0xff] }
 0x4a7   : > { %4149 = vst [vmem:[%s6755_s14 + $0x80] sm:$0xff] %v4085_v32  ;;  %v4087_v20 = vmax.f32 %v4023_v28, 0.0  ;;  %v5631_v28 = vld [vmem:[%s5852_s22 + $0xf8] sm:$0xff] }
 0x4a8   : > { %4150 = vst [vmem:[%s6755_s14 + $0x88] sm:$0xff] %v4086_v25  ;;  %v4088_v54 = vmax.f32 %v4024_v23, 0.0  ;;  %v3896_v33 = vpop.f32.mrb[116].mxu0 }
 0x4a9   : > { %4151 = vst [vmem:[%s6755_s14 + $0x90] sm:$0xff] %v4087_v20  ;;  %v3897_v45 = vadd.f32 %v3896_v33, %v6740_v8  ;;  %v3898_v48 = vpop.f32.mrb[117].mxu0 }
 0x4aa   : > { %4152 = vst [vmem:[%s6755_s14 + $0x98] sm:$0xff] %v4088_v54  ;;  %v3899_v22 = vadd.f32 %v3898_v48, %v6743_v6  ;;  %v3900_v42 = vpop.f32.mrb[118].mxu0 }
 0x4ab   : > { %v4025_v7 = vadd.f32 %v5620_v49, %v3897_v45  ;;  %v3901_v16 = vadd.f32 %v3900_v42, %v6740_v8  ;;  %v3902_v63 = vpop.f32.mrb[119].mxu0 }
 0x4ac   : > { %v4026_v39 = vadd.f32 %v5621_v55, %v3899_v22  ;;  %v3903_v62 = vadd.f32 %v3902_v63, %v6743_v6  ;;  %v5632_v22 = vld [vmem:[%s5852_s22 + $0x100] sm:$0xff] }
 0x4ad   : > { %v4089_v9 = vmax.f32 %v4025_v7, 0.0  ;;  %v4027_v2 = vadd.f32 %v5622_v61, %v3901_v16  ;;  %v5633_v16 = vld [vmem:[%s5852_s22 + $0x108] sm:$0xff] }
 0x4ae   : > { %v4090_v18 = vmax.f32 %v4026_v39, 0.0  ;;  %v4028_v4 = vadd.f32 %v5623_v26, %v3903_v62  ;;  %v5634_v62 = vld [vmem:[%s5852_s22 + $0x110] sm:$0xff] }
 0x4af   : > { %4153 = vst [vmem:[%s6755_s14 + $0xa0] sm:$0xff] %v4089_v9  ;;  %v4091_v36 = vmax.f32 %v4027_v2, 0.0  ;;  %v5635_v2 = vld [vmem:[%s5852_s22 + $0x118] sm:$0xff] }
 0x4b0   : > { %4154 = vst [vmem:[%s6755_s14 + $0xa8] sm:$0xff] %v4090_v18  ;;  %v4092_v15 = vmax.f32 %v4028_v4, 0.0  ;;  %v3906_v37 = vpop.f32.mrb[120].mxu0 }
 0x4b1   : > { %4155 = vst [vmem:[%s6755_s14 + $0xb0] sm:$0xff] %v4091_v36  ;;  %v3907_v46 = vadd.f32 %v3906_v37, %v6740_v8  ;;  %v3908_v47 = vpop.f32.mrb[121].mxu0 }
 0x4b2   : > { %4156 = vst [vmem:[%s6755_s14 + $0xb8] sm:$0xff] %v4092_v15  ;;  %v3909_v13 = vadd.f32 %v3908_v47, %v6743_v6  ;;  %v3910_v27 = vpop.f32.mrb[122].mxu0 }
 0x4b3   : > { %v4029_v59 = vadd.f32 %v5624_v17, %v3907_v46  ;;  %v3911_v30 = vadd.f32 %v3910_v27, %v6740_v8  ;;  %v3912_v44 = vpop.f32.mrb[123].mxu0 }
 0x4b4   : > { %v4030_v31 = vadd.f32 %v5625_v35, %v3909_v13  ;;  %v3913_v38 = vadd.f32 %v3912_v44, %v6743_v6  ;;  %v5636_v13 = vld [vmem:[%s5852_s22 + $0x120] sm:$0xff] }
 0x4b5   : > { %v4093_v40 = vmax.f32 %v4029_v59, 0.0  ;;  %v4031_v60 = vadd.f32 %v5626_v43, %v3911_v30  ;;  %v5637_v30 = vld [vmem:[%s5852_s22 + $0x128] sm:$0xff] }
 0x4b6   : > { %v4094_v51 = vmax.f32 %v4030_v31, 0.0  ;;  %v4032_v50 = vadd.f32 %v5627_v24, %v3913_v38  ;;  %v5638_v38 = vld [vmem:[%s5852_s22 + $0x130] sm:$0xff] }
 0x4b7   : > { %4157 = vst [vmem:[%s6755_s14 + $0xc0] sm:$0xff] %v4093_v40  ;;  %v4095_v52 = vmax.f32 %v4031_v60, 0.0  ;;  %v5639_v60 = vld [vmem:[%s5852_s22 + $0x138] sm:$0xff] }
 0x4b8   : > { %4158 = vst [vmem:[%s6755_s14 + $0xc8] sm:$0xff] %v4094_v51  ;;  %v4096_v3 = vmax.f32 %v4032_v50, 0.0  ;;  %v3916_v5 = vpop.f32.mrb[124].mxu0 }
 0x4b9   : > { %4159 = vst [vmem:[%s6755_s14 + $0xd0] sm:$0xff] %v4095_v52  ;;  %v3917_v53 = vadd.f32 %v3916_v5, %v6740_v8  ;;  %v3918_v29 = vpop.f32.mrb[125].mxu0 }
 0x4ba   : > { %4160 = vst [vmem:[%s6755_s14 + $0xd8] sm:$0xff] %v4096_v3  ;;  %v3919_v0 = vadd.f32 %v3918_v29, %v6743_v6  ;;  %v3920_v34 = vpop.f32.mrb[126].mxu0 }
 0x4bb   : > { %v4033_v14 = vadd.f32 %v5628_v10, %v3917_v53  ;;  %v3921_v41 = vadd.f32 %v3920_v34, %v6740_v8  ;;  %v3922_v12 = vpop.f32.mrb[127].mxu0 }
 0x4bc   : > { %v4034_v11 = vadd.f32 %v5629_v56, %v3919_v0  ;;  %v3923_v19 = vadd.f32 %v3922_v12, %v6743_v6  ;;  %v5640_v0 = vld [vmem:[%s5852_s22 + $0x140] sm:$0xff] }
 0x4bd   : > { %v4097_v58 = vmax.f32 %v4033_v14, 0.0  ;;  %v4035_v32 = vadd.f32 %v5630_v1, %v3921_v41  ;;  %v5641_v41 = vld [vmem:[%s5852_s22 + $0x148] sm:$0xff] }
 0x4be   : > { %v4098_v21 = vmax.f32 %v4034_v11, 0.0  ;;  %v4036_v25 = vadd.f32 %v5631_v28, %v3923_v19  ;;  %v5642_v19 = vld [vmem:[%s5852_s22 + $0x150] sm:$0xff] }
 0x4bf   : > { %4161 = vst [vmem:[%s6755_s14 + $0xe0] sm:$0xff] %v4097_v58  ;;  %v4099_v57 = vmax.f32 %v4035_v32, 0.0  ;;  %v5643_v32 = vld [vmem:[%s5852_s22 + $0x158] sm:$0xff] }
 0x4c0   : > { %4162 = vst [vmem:[%s6755_s14 + $0xe8] sm:$0xff] %v4098_v21  ;;  %v4100_v23 = vmax.f32 %v4036_v25, 0.0  ;;  %v3926_v20 = vpop.f32.mrb[128].mxu0 }
 0x4c1   : > { %4163 = vst [vmem:[%s6755_s14 + $0xf0] sm:$0xff] %v4099_v57  ;;  %v3927_v54 = vadd.f32 %v3926_v20, %v6740_v8  ;;  %v3928_v33 = vpop.f32.mrb[129].mxu0 }
 0x4c2   : > { %4164 = vst [vmem:[%s6755_s14 + $0xf8] sm:$0xff] %v4100_v23  ;;  %v3929_v45 = vadd.f32 %v3928_v33, %v6743_v6  ;;  %v3930_v48 = vpop.f32.mrb[130].mxu0 }
 0x4c3   : > { %v4037_v42 = vadd.f32 %v5632_v22, %v3927_v54  ;;  %v3931_v49 = vadd.f32 %v3930_v48, %v6740_v8  ;;  %v3932_v7 = vpop.f32.mrb[131].mxu0 }
 0x4c4   : > { %v4038_v63 = vadd.f32 %v5633_v16, %v3929_v45  ;;  %v3933_v55 = vadd.f32 %v3932_v7, %v6743_v6  ;;  %v5644_v45 = vld [vmem:[%s5852_s22 + $0x160] sm:$0xff] }
 0x4c5   : > { %v4101_v39 = vmax.f32 %v4037_v42, 0.0  ;;  %v4039_v9 = vadd.f32 %v5634_v62, %v3931_v49  ;;  %v5645_v49 = vld [vmem:[%s5852_s22 + $0x168] sm:$0xff] }
 0x4c6   : > { %v4102_v61 = vmax.f32 %v4038_v63, 0.0  ;;  %v4040_v18 = vadd.f32 %v5635_v2, %v3933_v55  ;;  %v5646_v55 = vld [vmem:[%s5852_s22 + $0x170] sm:$0xff] }
 0x4c7   : > { %4165 = vst [vmem:[%s6755_s14 + $0x100] sm:$0xff] %v4101_v39  ;;  %v4103_v26 = vmax.f32 %v4039_v9, 0.0  ;;  %v5647_v9 = vld [vmem:[%s5852_s22 + $0x178] sm:$0xff] }
 0x4c8   : > { %4166 = vst [vmem:[%s6755_s14 + $0x108] sm:$0xff] %v4102_v61  ;;  %v4104_v4 = vmax.f32 %v4040_v18, 0.0  ;;  %v3936_v36 = vpop.f32.mrb[132].mxu0 }
 0x4c9   : > { %4167 = vst [vmem:[%s6755_s14 + $0x110] sm:$0xff] %v4103_v26  ;;  %v3937_v15 = vadd.f32 %v3936_v36, %v6740_v8  ;;  %v3938_v37 = vpop.f32.mrb[133].mxu0 }
 0x4ca   : > { %4168 = vst [vmem:[%s6755_s14 + $0x118] sm:$0xff] %v4104_v4  ;;  %v3939_v46 = vadd.f32 %v3938_v37, %v6743_v6  ;;  %v3940_v47 = vpop.f32.mrb[134].mxu0 }
 0x4cb   : > { %v4041_v27 = vadd.f32 %v5636_v13, %v3937_v15  ;;  %v3941_v17 = vadd.f32 %v3940_v47, %v6740_v8  ;;  %v3942_v59 = vpop.f32.mrb[135].mxu0 }
 0x4cc   : > { %v4042_v44 = vadd.f32 %v5637_v30, %v3939_v46  ;;  %v3943_v35 = vadd.f32 %v3942_v59, %v6743_v6  ;;  %v5648_v46 = vld [vmem:[%s5852_s22 + $0x180] sm:$0xff] }
 0x4cd   : > { %v4105_v31 = vmax.f32 %v4041_v27, 0.0  ;;  %v4043_v40 = vadd.f32 %v5638_v38, %v3941_v17  ;;  %v5649_v17 = vld [vmem:[%s5852_s22 + $0x188] sm:$0xff] }
 0x4ce   : > { %v4106_v43 = vmax.f32 %v4042_v44, 0.0  ;;  %v4044_v51 = vadd.f32 %v5639_v60, %v3943_v35  ;;  %v5650_v35 = vld [vmem:[%s5852_s22 + $0x190] sm:$0xff] }
 0x4cf   : > { %4169 = vst [vmem:[%s6755_s14 + $0x120] sm:$0xff] %v4105_v31  ;;  %v4107_v24 = vmax.f32 %v4043_v40, 0.0  ;;  %v5651_v40 = vld [vmem:[%s5852_s22 + $0x198] sm:$0xff] }
 0x4d0   : > { %4170 = vst [vmem:[%s6755_s14 + $0x128] sm:$0xff] %v4106_v43  ;;  %v4108_v50 = vmax.f32 %v4044_v51, 0.0  ;;  %v3946_v52 = vpop.f32.mrb[136].mxu0 }
 0x4d1   : > { %4171 = vst [vmem:[%s6755_s14 + $0x130] sm:$0xff] %v4107_v24  ;;  %v3947_v3 = vadd.f32 %v3946_v52, %v6740_v8  ;;  %v3948_v5 = vpop.f32.mrb[137].mxu0 }
 0x4d2   : > { %4172 = vst [vmem:[%s6755_s14 + $0x138] sm:$0xff] %v4108_v50  ;;  %v3949_v53 = vadd.f32 %v3948_v5, %v6743_v6  ;;  %v3950_v29 = vpop.f32.mrb[138].mxu0 }
 0x4d3   : > { %v4045_v34 = vadd.f32 %v5640_v0, %v3947_v3  ;;  %v3951_v10 = vadd.f32 %v3950_v29, %v6740_v8  ;;  %v3952_v14 = vpop.f32.mrb[139].mxu0 }
 0x4d4   : > { %v4046_v12 = vadd.f32 %v5641_v41, %v3949_v53  ;;  %v3953_v56 = vadd.f32 %v3952_v14, %v6743_v6  ;;  %v5652_v53 = vld [vmem:[%s5852_s22 + $0x1a0] sm:$0xff] }
 0x4d5   : > { %v4109_v11 = vmax.f32 %v4045_v34, 0.0  ;;  %v4047_v58 = vadd.f32 %v5642_v19, %v3951_v10  ;;  %v5653_v10 = vld [vmem:[%s5852_s22 + $0x1a8] sm:$0xff] }
 0x4d6   : > { %v4110_v1 = vmax.f32 %v4046_v12, 0.0  ;;  %v4048_v21 = vadd.f32 %v5643_v32, %v3953_v56  ;;  %v5654_v56 = vld [vmem:[%s5852_s22 + $0x1b0] sm:$0xff] }
 0x4d7   : > { %4173 = vst [vmem:[%s6755_s14 + $0x140] sm:$0xff] %v4109_v11  ;;  %v4111_v28 = vmax.f32 %v4047_v58, 0.0  ;;  %v5655_v58 = vld [vmem:[%s5852_s22 + $0x1b8] sm:$0xff] }
 0x4d8   : > { %4174 = vst [vmem:[%s6755_s14 + $0x148] sm:$0xff] %v4110_v1  ;;  %v4112_v25 = vmax.f32 %v4048_v21, 0.0  ;;  %v3956_v57 = vpop.f32.mrb[140].mxu0 }
 0x4d9   : > { %4175 = vst [vmem:[%s6755_s14 + $0x150] sm:$0xff] %v4111_v28  ;;  %v3957_v23 = vadd.f32 %v3956_v57, %v6740_v8  ;;  %v3958_v20 = vpop.f32.mrb[141].mxu0 }
 0x4da   : > { %4176 = vst [vmem:[%s6755_s14 + $0x158] sm:$0xff] %v4112_v25  ;;  %v3959_v54 = vadd.f32 %v3958_v20, %v6743_v6  ;;  %v3960_v33 = vpop.f32.mrb[142].mxu0 }
 0x4db   : > { %v4049_v48 = vadd.f32 %v5644_v45, %v3957_v23  ;;  %v3961_v22 = vadd.f32 %v3960_v33, %v6740_v8  ;;  %v3962_v42 = vpop.f32.mrb[143].mxu0 }
 0x4dc   : > { %v4050_v7 = vadd.f32 %v5645_v49, %v3959_v54  ;;  %v3963_v16 = vadd.f32 %v3962_v42, %v6743_v6  ;;  %v5656_v54 = vld [vmem:[%s5852_s22 + $0x1c0] sm:$0xff] }
 0x4dd   : > { %v4113_v63 = vmax.f32 %v4049_v48, 0.0  ;;  %v4051_v39 = vadd.f32 %v5646_v55, %v3961_v22  ;;  %v5657_v22 = vld [vmem:[%s5852_s22 + $0x1c8] sm:$0xff] }
 0x4de   : > { %v4114_v62 = vmax.f32 %v4050_v7, 0.0  ;;  %v4052_v61 = vadd.f32 %v5647_v9, %v3963_v16  ;;  %v5658_v16 = vld [vmem:[%s5852_s22 + $0x1d0] sm:$0xff] }
 0x4df   : > { %4177 = vst [vmem:[%s6755_s14 + $0x160] sm:$0xff] %v4113_v63  ;;  %v4115_v2 = vmax.f32 %v4051_v39, 0.0  ;;  %v5659_v39 = vld [vmem:[%s5852_s22 + $0x1d8] sm:$0xff] }
 0x4e0   : > { %4178 = vst [vmem:[%s6755_s14 + $0x168] sm:$0xff] %v4114_v62  ;;  %v4116_v18 = vmax.f32 %v4052_v61, 0.0  ;;  %v3966_v26 = vpop.f32.mrb[144].mxu0 }
 0x4e1   : > { %4179 = vst [vmem:[%s6755_s14 + $0x170] sm:$0xff] %v4115_v2  ;;  %v3967_v4 = vadd.f32 %v3966_v26, %v6740_v8  ;;  %v3968_v36 = vpop.f32.mrb[145].mxu0 }
 0x4e2   : > { %4180 = vst [vmem:[%s6755_s14 + $0x178] sm:$0xff] %v4116_v18  ;;  %v3969_v15 = vadd.f32 %v3968_v36, %v6743_v6  ;;  %v3970_v37 = vpop.f32.mrb[146].mxu0 }
 0x4e3   : > { %v4053_v47 = vadd.f32 %v5648_v46, %v3967_v4  ;;  %v3971_v13 = vadd.f32 %v3970_v37, %v6740_v8  ;;  %v3972_v27 = vpop.f32.mrb[147].mxu0 }
 0x4e4   : > { %v4054_v59 = vadd.f32 %v5649_v17, %v3969_v15  ;;  %v3973_v30 = vadd.f32 %v3972_v27, %v6743_v6  ;;  %v5660_v15 = vld [vmem:[%s5852_s22 + $0x1e0] sm:$0xff] }
 0x4e5   : > { %v4117_v44 = vmax.f32 %v4053_v47, 0.0  ;;  %v4055_v31 = vadd.f32 %v5650_v35, %v3971_v13  ;;  %v5661_v13 = vld [vmem:[%s5852_s22 + $0x1e8] sm:$0xff] }
 0x4e6   : > { %v4118_v38 = vmax.f32 %v4054_v59, 0.0  ;;  %v4056_v43 = vadd.f32 %v5651_v40, %v3973_v30  ;;  %v5662_v30 = vld [vmem:[%s5852_s22 + $0x1f0] sm:$0xff] }
 0x4e7   : > { %4181 = vst [vmem:[%s6755_s14 + $0x180] sm:$0xff] %v4117_v44  ;;  %v4119_v60 = vmax.f32 %v4055_v31, 0.0  ;;  %v5663_v31 = vld [vmem:[%s5852_s22 + $0x1f8] sm:$0xff]  ;;  %s5664_s22 = scalar_lea.vmem %s6945_s17, 8192 }
 0x4e8   : > { %4182 = vst [vmem:[%s6755_s14 + $0x188] sm:$0xff] %v4118_v38  ;;  %v4120_v51 = vmax.f32 %v4056_v43, 0.0  ;;  %v3976_v24 = vpop.f32.mrb[148].mxu0  ;;  %p5665_p11 = scmp.ne.s32.totalorder %s6945_s17, %s5664_s22  ;;  %p5672_p1 = scmp.lt.s32.totalorder %s5670_s15, %s5664_s22 }
 0x4e9   : > { %4183 = vst [vmem:[%s6755_s14 + $0x190] sm:$0xff] %v4119_v60  ;;  %v3977_v50 = vadd.f32 %v3976_v24, %v6740_v8  ;;  %v3978_v52 = vpop.f32.mrb[149].mxu0 }
 0x4ea   : > { %4184 = vst [vmem:[%s6755_s14 + $0x198] sm:$0xff] %v4120_v51  ;;  %v3979_v3 = vadd.f32 %v3978_v52, %v6743_v6  ;;  %v3980_v5 = vpop.f32.mrb[150].mxu0  ;;  %p5666_p12 = pnand %p5665_p11, %p5811_p5  ;;  %p5673_p2 = por %p5672_p1, %p5671_p0 }
 0x4eb   : > { %v4057_v29 = vadd.f32 %v5652_v53, %v3977_v50  ;;  %v3981_v0 = vadd.f32 %v3980_v5, %v6740_v8  ;;  %v3982_v34 = vpop.f32.mrb[151].mxu0 }
 0x4ec   : > { %v4058_v14 = vadd.f32 %v5653_v10, %v3979_v3  ;;  %v3983_v41 = vadd.f32 %v3982_v34, %v6743_v6  ;;  %p5667_p13 = pneg %p5666_p12 }
 0x4ed   : > { %v4121_v12 = vmax.f32 %v4057_v29, 0.0  ;;  %v4059_v11 = vadd.f32 %v5654_v56, %v3981_v0 }
 0x4ee   : > { %v4122_v19 = vmax.f32 %v4058_v14, 0.0  ;;  %v4060_v1 = vadd.f32 %v5655_v58, %v3983_v41  ;;  %p5674_p3 = pnand %p5673_p2, %p5667_p13 }
 0x4ef   : > { %4185 = vst [vmem:[%s6755_s14 + $0x1a0] sm:$0xff] %v4121_v12  ;;  %v4123_v32 = vmax.f32 %v4059_v11, 0.0 }
 0x4f0   : > { %4186 = vst [vmem:[%s6755_s14 + $0x1a8] sm:$0xff] %v4122_v19  ;;  %v4124_v21 = vmax.f32 %v4060_v1, 0.0  ;;  %v3986_v28 = vpop.f32.mrb[152].mxu0 }
 0x4f1   : > { %4187 = vst [vmem:[%s6755_s14 + $0x1b0] sm:$0xff] %v4123_v32  ;;  %v3987_v25 = vadd.f32 %v3986_v28, %v6740_v8  ;;  %v3988_v57 = vpop.f32.mrb[153].mxu0 }
 0x4f2   : > { %4188 = vst [vmem:[%s6755_s14 + $0x1b8] sm:$0xff] %v4124_v21  ;;  %v3989_v23 = vadd.f32 %v3988_v57, %v6743_v6  ;;  %v3990_v20 = vpop.f32.mrb[154].mxu0 }
 0x4f3   : > { %v4061_v33 = vadd.f32 %v5656_v54, %v3987_v25  ;;  %v3991_v45 = vadd.f32 %v3990_v20, %v6740_v8  ;;  %v3992_v48 = vpop.f32.mrb[155].mxu0 }
 0x4f4   : > { %v4062_v42 = vadd.f32 %v5657_v22, %v3989_v23  ;;  %v3993_v49 = vadd.f32 %v3992_v48, %v6743_v6 }
 0x4f5   : > { %v4125_v7 = vmax.f32 %v4061_v33, 0.0  ;;  %v4063_v63 = vadd.f32 %v5658_v16, %v3991_v45 }
 0x4f6   : > { %v4126_v55 = vmax.f32 %v4062_v42, 0.0  ;;  %v4064_v62 = vadd.f32 %v5659_v39, %v3993_v49 }
 0x4f7   : > { %4189 = vst [vmem:[%s6755_s14 + $0x1c0] sm:$0xff] %v4125_v7  ;;  %v4127_v9 = vmax.f32 %v4063_v63, 0.0 }
 0x4f8   : > { %4190 = vst [vmem:[%s6755_s14 + $0x1c8] sm:$0xff] %v4126_v55  ;;  %v4128_v61 = vmax.f32 %v4064_v62, 0.0  ;;  %v3996_v2 = vpop.f32.mrb[156].mxu0 }
 0x4f9   : > { %4191 = vst [vmem:[%s6755_s14 + $0x1d0] sm:$0xff] %v4127_v9  ;;  %v3997_v18 = vadd.f32 %v3996_v2, %v6740_v8  ;;  %v3998_v26 = vpop.f32.mrb[157].mxu0 }
 0x4fa   : > { %4192 = vst [vmem:[%s6755_s14 + $0x1d8] sm:$0xff] %v4128_v61  ;;  %v3999_v4 = vadd.f32 %v3998_v26, %v6743_v6  ;;  %v4000_v36 = vpop.f32.mrb[158].mxu0 }
 0x4fb   : > { %v4065_v37 = vadd.f32 %v5660_v15, %v3997_v18  ;;  %v4001_v46 = vadd.f32 %v4000_v36, %v6740_v8  ;;  %v4002_v47 = vpop.f32.mrb[159].mxu0 }
 0x4fc   : > { %v4066_v27 = vadd.f32 %v5661_v13, %v3999_v4  ;;  %v4003_v17 = vadd.f32 %v4002_v47, %v6743_v6 }
 0x4fd   : > { %v4129_v59 = vmax.f32 %v4065_v37, 0.0  ;;  %v4067_v44 = vadd.f32 %v5662_v30, %v4001_v46 }
 0x4fe   : > { %v4130_v35 = vmax.f32 %v4066_v27, 0.0  ;;  %v4068_v38 = vadd.f32 %v5663_v31, %v4003_v17 }
 0x4ff   : > { %4193 = vst [vmem:[%s6755_s14 + $0x1e0] sm:$0xff] %v4129_v59  ;;  %v4131_v8 = vmax.f32 %v4067_v44, 0.0 }
 0x500   : > { %4194 = vst [vmem:[%s6755_s14 + $0x1e8] sm:$0xff] %v4130_v35  ;;  %v4132_v6 = vmax.f32 %v4068_v38, 0.0 }
 0x501   : > { %4195 = vst [vmem:[%s6755_s14 + $0x1f0] sm:$0xff] %v4131_v8 }
 0x502   : > { %4196 = vst [vmem:[%s6755_s14 + $0x1f8] sm:$0xff] %v4132_v6 }
 0x503   : > { %5677 = shalt.err (!%p5674_p3)
}
 0x504   : > { %s5678_s29 = scalar_lea.hbm %s6943_s20, 8192  ;;  %s5682_s13 = scalar_lea.hbm %s7000_s7, 16384 }
 0x505   : > { %p5679_p4 = scmp.ne.s32.totalorder %s6943_s20, %s5678_s29  ;;  %p5683_p9 = scmp.lt.u32.totalorder %s6943_s20, %s7000_s7 }
 0x506   : > { %p5684_p10 = scmp.lt.u32.totalorder %s5682_s13, %s5678_s29  ;;  %p5686_p12 = scmp.lt.u32.totalorder %s5678_s29, %s6943_s20 }
 0x507   : > { %p5680_p7 = pnand %p5679_p4, %p5811_p5 }
 0x508   : > { %p5685_p11 = por %p5684_p10, %p5683_p9 }
 0x509   : > { %p5681_p8 = pneg %p5680_p7 }
 0x50a   : > { %p5687_p13 = por %p5686_p12, %p5685_p11 }
 0x50c   : > { %p5688_p0 = pnand %p5687_p13, %p5681_p8 }
 0x50e   : > { %5691 = shalt.err (!%p5688_p0)
}
 0x50f   : > { %s5731_s18 = smov 256   ;;  %s5732_s19 = smov 16  }
 0x510   : > { %5493 = dma.vmem_to_hbm [thread:$0]  (%p5811_p5), %s6945_s17, 8192, %s6943_s20, %s6952_s28, %s5731_s18, %s5731_s18, %s5732_s19  }
 0x511 PF: > { %p5499_p1 = scmp.ge.s32.totalorder %s5726_s27, 2  ;;  %s4227_s22 = sand.u32 1, %s5714_s24  }
 0x512   : > { %s4228_s21 = scalar_lea.sflag [#allocation4], %s4227_s22 }
 0x513   : > { %p5496_p2 = pnand %p5499_p1, %p5815_p6 }
 0x515   : > { %5709 = dma.done.wait (!%p5496_p2), %s4228_s21, 8192  }
 0x516   : > { %5711 = vsyncadd (!%p5496_p2), %s4228_s21, 4294959104  ;;  %p17_p3 = scmp.ge.s32.totalorder %s5798_s30, 4   ;;  %s7003_s24 = smov %s5718_s25 }
 0x517   : > { %s7004_s25 = smov %s5722_s26  ;;  %s7005_s26 = smov %s5809_s10 }
 0x518   : > { %s7006_s27 = smov %s5798_s30  ;;  %19 = sbr.rel (!%p17_p3) target bundleno = 3 (0x3), region = 94 }
 0x51f   :  { %4233 = vsyncpa [#allocation4], 1 }
 0x520   :  { %4235 = vsyncpa [#allocation4 + $0x1], 1 }

</bundles_post_ra>
